<compile_context>
chip_gen: v7x
topology: tpu7x:2x2x1
jax: 0.10.0
libtpu: 0.0.40
codegen_flags: <defaults>
</compile_context>

<pallas_src>
import jax
import jax.numpy as jnp
from jax.experimental import pallas as pl
from jax.experimental.pallas import tpu as pltpu


def lstm_decode_kernel(x_ref, wih_ref, whh_ref, b_ref, wdec_ref, bdec_ref,
                       out_ref, h_sc, c_sc, xg_sc, hs_sc):
    # x_ref:    (Tc, Bp, I)   time-major input chunk (batch padded to sublanes)
    # wih_ref:  (I, 4H)       input->gate weights (transposed; gate order i,f,o,g)
    # whh_ref:  (H, 4H)       hidden->gate weights (transposed; gate order i,f,o,g)
    # b_ref:    (1, 4H)       combined bias b_ih + b_hh (reordered)
    # wdec_ref: (H, 2)        decoder weights (transposed)
    # bdec_ref: (1, 2)        decoder bias
    # out_ref:  (Tc, Bp, 2)   sigmoid(decode(h_t)) for this chunk
    # h_sc/c_sc:(Bp, H)       recurrent state, persists across grid steps
    # xg_sc:    (Tc, Bp, 4H)  precomputed x·W_ih + b for this chunk
    # hs_sc:    (Tc, Bp, H)   h history for this chunk (batched decode)
    Tc, Bp, I = x_ref.shape
    H = h_sc.shape[1]

    @pl.when(pl.program_id(0) == 0)
    def _():
        h_sc[...] = jnp.zeros_like(h_sc)
        c_sc[...] = jnp.zeros_like(c_sc)

    # --- (1) Hoisted input projection: one big MXU matmul for the chunk. -----
    x_flat = x_ref[...].reshape(Tc * Bp, I)
    xg = jnp.dot(x_flat, wih_ref[...], preferred_element_type=jnp.float32)
    xg_sc[...] = (xg + b_ref[...]).reshape(Tc, Bp, 4 * H)   # bias folded once

    # --- (2) Serial recurrence: only h·W_hh + elementwise per step. ----------
    # h/c are fori_loop carries; W_hh is read from VMEM once outside the loop.
    w_hh = whh_ref[...]

    def step(t, carry):
        h, c = carry
        gates = xg_sc[t] + jnp.dot(h, w_hh, preferred_element_type=jnp.float32)
        # gate order [i, f, o, g]: one sigmoid over 3H lanes, one tanh over H.
        sig = jax.nn.sigmoid(gates[:, 0:3 * H])
        i_g = sig[:, 0 * H:1 * H]
        f_g = sig[:, 1 * H:2 * H]
        o_g = sig[:, 2 * H:3 * H]
        g_g = jnp.tanh(gates[:, 3 * H:4 * H])
        c_new = f_g * c + i_g * g_g
        h_new = o_g * jnp.tanh(c_new)
        hs_sc[t] = h_new
        return h_new, c_new

    h_fin, c_fin = jax.lax.fori_loop(0, Tc, step, (h_sc[...], c_sc[...]),
                                     unroll=True)
    h_sc[...] = h_fin            # carry state into the next time-chunk
    c_sc[...] = c_fin

    # --- (3) Batched decode: one matmul + one store for the whole chunk. -----
    hs_flat = hs_sc[...].reshape(Tc * Bp, H)
    d = jnp.dot(hs_flat, wdec_ref[...], preferred_element_type=jnp.float32)
    out_ref[...] = jax.nn.sigmoid(d + bdec_ref[...]).reshape(Tc, Bp, 2)


def model_gj_forward(x, params, *, t_chunk=8):
    """x: (B, T, I) float32, batch-first (like nn.LSTM(batch_first=True)).

    params holds PyTorch-layout weights (see init_params). Returns (xd, yd),
    each (B, T), matching modelGj.forward.
    """
    B, T, I = x.shape
    w_ih, w_hh = params["w_ih"], params["w_hh"]          # (4H, I), (4H, H)
    b_ih, b_hh = params["b_ih"], params["b_hh"]          # (4H,), (4H,)
    w_dec, b_dec = params["w_dec"], params["b_dec"]      # (2, H), (2,)
    H = w_hh.shape[1]

    # Reorder gate rows from PyTorch [i, f, g, o] to kernel [i, f, o, g] and
    # transpose to MXU-friendly (in, out) layouts; biases folded together.
    order = jnp.concatenate([
        jnp.arange(0 * H, 2 * H),      # i, f
        jnp.arange(3 * H, 4 * H),      # o
        jnp.arange(2 * H, 3 * H),      # g
    ])
    w_ih_k = jnp.transpose(w_ih[order])                    # (I, 4H)
    w_hh_k = jnp.transpose(w_hh[order])                    # (H, 4H)
    b_k = (b_ih + b_hh)[order].reshape(1, 4 * H)           # (1, 4H)
    w_dec_k = jnp.transpose(w_dec)                         # (H, 2)
    b_dec_k = b_dec.reshape(1, 2)                          # (1, 2)

    Bp = max(8, -(-B // 8) * 8)          # pad batch to a sublane multiple
    Tc = min(t_chunk, T)                 # timesteps per grid step
    Tp = -(-T // Tc) * Tc                # pad time to a whole number of chunks

    # time-major + zero padding; padded rows/steps are dropped below.
    x_tm = jnp.transpose(x, (1, 0, 2))                        # (T, B, I)
    x_tm = jnp.pad(x_tm, ((0, Tp - T), (0, Bp - B), (0, 0)))  # (Tp, Bp, I)

    out = pl.pallas_call(
        lstm_decode_kernel,
        out_shape=jax.ShapeDtypeStruct((Tp, Bp, 2), jnp.float32),
        grid_spec=pltpu.PrefetchScalarGridSpec(
            num_scalar_prefetch=0,
            grid=(Tp // Tc,),
            in_specs=[
                pl.BlockSpec((Tc, Bp, I), lambda k: (k, 0, 0)),   # x chunk
                pl.BlockSpec((I, 4 * H), lambda k: (0, 0)),       # W_ih^T
                pl.BlockSpec((H, 4 * H), lambda k: (0, 0)),       # W_hh^T
                pl.BlockSpec((1, 4 * H), lambda k: (0, 0)),       # bias
                pl.BlockSpec((H, 2), lambda k: (0, 0)),           # W_dec^T
                pl.BlockSpec((1, 2), lambda k: (0, 0)),           # b_dec
            ],
            out_specs=pl.BlockSpec((Tc, Bp, 2), lambda k: (k, 0, 0)),
            scratch_shapes=[
                pltpu.VMEM((Bp, H), jnp.float32),                 # h state
                pltpu.VMEM((Bp, H), jnp.float32),                 # c state
                pltpu.VMEM((Tc, Bp, 4 * H), jnp.float32),         # x·W_ih + b
                pltpu.VMEM((Tc, Bp, H), jnp.float32),             # h history
            ],
        ),
        compiler_params=pltpu.CompilerParams(
            dimension_semantics=("arbitrary",),   # sequential recurrence
            vmem_limit_bytes=32 * 1024 * 1024,
        ),
    )(x_tm, w_ih_k, w_hh_k, b_k, w_dec_k, b_dec_k)

    xd = jnp.transpose(out[:T, :B, 0])    # (B, T)
    yd = jnp.transpose(out[:T, :B, 1])    # (B, T)
    return xd, yd


def model_gj_reference(x, params):
    """Pure-JAX reference in PyTorch gate order (same math) for correctness."""
    w_ih, w_hh = params["w_ih"], params["w_hh"]
    b_ih, b_hh = params["b_ih"], params["b_hh"]
    w_dec, b_dec = params["w_dec"], params["b_dec"]
    H = w_hh.shape[1]

    def step(carry, x_t):
        h, c = carry
        gates = x_t @ w_ih.T + h @ w_hh.T + b_ih + b_hh
        i_g = jax.nn.sigmoid(gates[:, 0 * H:1 * H])
        f_g = jax.nn.sigmoid(gates[:, 1 * H:2 * H])
        g_g = jnp.tanh(gates[:, 2 * H:3 * H])
        o_g = jax.nn.sigmoid(gates[:, 3 * H:4 * H])
        c_new = f_g * c + i_g * g_g
        h_new = o_g * jnp.tanh(c_new)
        return (h_new, c_new), h_new

    B = x.shape[0]
    h0 = jnp.zeros((B, H), jnp.float32)
    c0 = jnp.zeros((B, H), jnp.float32)
    _, hs = jax.lax.scan(step, (h0, c0), jnp.transpose(x, (1, 0, 2)))  # (T,B,H)
    alld = jax.nn.sigmoid(hs @ w_dec.T + b_dec)                        # (T,B,2)
    return jnp.transpose(alld[:, :, 0]), jnp.transpose(alld[:, :, 1])


def init_params(key, input_size, hidden_size, out_features=2):
    """PyTorch-layout parameters: nn.LSTM(input_size, hidden_size) weights in
    gate order [i, f, g, o], plus nn.Linear(hidden_size, 2)."""
    ks = jax.random.split(key, 6)
    s = 1.0 / jnp.sqrt(hidden_size)
    return {
        "w_ih": jax.random.uniform(ks[0], (4 * hidden_size, input_size), jnp.float32, -s, s),
        "w_hh": jax.random.uniform(ks[1], (4 * hidden_size, hidden_size), jnp.float32, -s, s),
        "b_ih": jax.random.uniform(ks[2], (4 * hidden_size,), jnp.float32, -s, s),
        "b_hh": jax.random.uniform(ks[3], (4 * hidden_size,), jnp.float32, -s, s),
        "w_dec": jax.random.uniform(ks[4], (out_features, hidden_size), jnp.float32, -s, s),
        "b_dec": jax.random.uniform(ks[5], (out_features,), jnp.float32, -s, s),
    }


if __name__ == "__main__":
    # H chosen as a multiple of 128 so gate slices are exact lane-width views
    # and 4H fills whole vreg lanes / MXU columns.
    B, T, I, H = 2, 8, 16, 128
    key = jax.random.PRNGKey(0)
    k_x, k_p = jax.random.split(key)
    x = jax.random.normal(k_x, (B, T, I), jnp.float32)
    params = init_params(k_p, I, H)

    xd, yd = model_gj_forward(x, params)
    jax.block_until_ready((xd, yd))

    xd_ref, yd_ref = model_gj_reference(x, params)
    assert xd.shape == (B, T) and yd.shape == (B, T)
    assert jnp.allclose(xd, xd_ref, atol=1e-5, rtol=1e-5)
    assert jnp.allclose(yd, yd_ref, atol=1e-5, rtol=1e-5)

    print("KERNEL_OK")
</pallas_src>

<mosaic_0001>
module attributes {stable_mosaic.version = 11 : i64} {
  func.func @lstm_decode_kernel(%arg0: i32, %arg1: memref<8x8x16xf32, #tpu.memory_space<vmem>>, %arg2: memref<16x512xf32, #tpu.memory_space<vmem>>, %arg3: memref<128x512xf32, #tpu.memory_space<vmem>>, %arg4: memref<1x512xf32, #tpu.memory_space<vmem>>, %arg5: memref<128x2xf32, #tpu.memory_space<vmem>>, %arg6: memref<1x2xf32, #tpu.memory_space<vmem>>, %arg7: memref<8x8x2xf32, #tpu.memory_space<vmem>>, %arg8: memref<8x128xf32, #tpu.memory_space<vmem>>, %arg9: memref<8x128xf32, #tpu.memory_space<vmem>>, %arg10: memref<8x8x512xf32, #tpu.memory_space<vmem>>, %arg11: memref<8x8x128xf32, #tpu.memory_space<vmem>>) attributes {dimension_semantics = [#tpu.dimension_semantics<arbitrary>], iteration_bounds = array<i64: 1>, scalar_prefetch = 0 : i64, scratch_operands = 4 : i64, tpu.core_type = #tpu.core_type<tc>, window_params = [{transform_indices = @transform_0, window_bounds = array<i64: 8, 8, 16>}, {pipeline_mode = #tpu.pipeline_mode<synchronous>, transform_indices = @transform_1, window_bounds = array<i64: 16, 512>}, {pipeline_mode = #tpu.pipeline_mode<synchronous>, transform_indices = @transform_2, window_bounds = array<i64: 128, 512>}, {pipeline_mode = #tpu.pipeline_mode<synchronous>, transform_indices = @transform_3, window_bounds = array<i64: 1, 512>}, {pipeline_mode = #tpu.pipeline_mode<synchronous>, transform_indices = @transform_4, window_bounds = array<i64: 128, 2>}, {pipeline_mode = #tpu.pipeline_mode<synchronous>, transform_indices = @transform_5, window_bounds = array<i64: 1, 2>}, {transform_indices = @transform_6, window_bounds = array<i64: 8, 8, 2>}]} {
    %c0_i32 = arith.constant 0 : i32
    %0 = arith.cmpi eq, %arg0, %c0_i32 : i32
    %1 = arith.extui %0 : i1 to i32
    %c0_i32_0 = arith.constant 0 : i32
    %2 = arith.cmpi ne, %1, %c0_i32_0 : i32
    scf.if %2 {
      %cst_81 = arith.constant 0.000000e+00 : f32
      %231 = vector.broadcast %cst_81 : f32 to vector<8x128xf32>
      %c0_82 = arith.constant 0 : index
      %c0_83 = arith.constant 0 : index
      %232 = vector.load %arg8[%c0_82, %c0_83] : memref<8x128xf32, #tpu.memory_space<vmem>>, vector<8x128xf32>
      tpu.vector_store %arg8[%c0_82, %c0_83], %231 {strides = array<i32>} : memref<8x128xf32, #tpu.memory_space<vmem>>, vector<8x128xf32>,
      %cst_84 = arith.constant 0.000000e+00 : f32
      %233 = vector.broadcast %cst_84 : f32 to vector<8x128xf32>
      %c0_85 = arith.constant 0 : index
      %c0_86 = arith.constant 0 : index
      %234 = vector.load %arg9[%c0_85, %c0_86] : memref<8x128xf32, #tpu.memory_space<vmem>>, vector<8x128xf32>
      tpu.vector_store %arg9[%c0_85, %c0_86], %233 {strides = array<i32>} : memref<8x128xf32, #tpu.memory_space<vmem>>, vector<8x128xf32>,
    } else {
    }
    %c0 = arith.constant 0 : index
    %c0_1 = arith.constant 0 : index
    %c0_2 = arith.constant 0 : index
    %3 = vector.load %arg1[%c0, %c0_1, %c0_2] : memref<8x8x16xf32, #tpu.memory_space<vmem>>, vector<8x8x16xf32>
    %4 = vector.shape_cast %3 : vector<8x8x16xf32> to vector<64x16xf32>
    %c0_3 = arith.constant 0 : index
    %c0_4 = arith.constant 0 : index
    %5 = vector.load %arg2[%c0_3, %c0_4] : memref<16x512xf32, #tpu.memory_space<vmem>>, vector<16x512xf32>
    %cst = arith.constant dense<0.000000e+00> : vector<64x512xf32>
    %6 = tpu.matmul %4, %5, %cst {dimension_numbers = #tpu.dot_dimension_numbers<[1], [0], [0], [1], [0, 0, 1, 1], [], []>} : vector<64x16xf32>, vector<16x512xf32>, vector<64x512xf32> -> vector<64x512xf32>
    %c0_5 = arith.constant 0 : index
    %c0_6 = arith.constant 0 : index
    %7 = vector.load %arg4[%c0_5, %c0_6] : memref<1x512xf32, #tpu.memory_space<vmem>>, vector<1x512xf32>
    %8 = vector.broadcast %7 : vector<1x512xf32> to vector<64x512xf32>
    %9 = arith.addf %6, %8 : vector<64x512xf32>
    %10 = vector.shape_cast %9 : vector<64x512xf32> to vector<8x8x512xf32>
    %c0_7 = arith.constant 0 : index
    %c0_8 = arith.constant 0 : index
    %c0_9 = arith.constant 0 : index
    %11 = vector.load %arg10[%c0_7, %c0_8, %c0_9] : memref<8x8x512xf32, #tpu.memory_space<vmem>>, vector<8x8x512xf32>
    tpu.vector_store %arg10[%c0_7, %c0_8, %c0_9], %10 {strides = array<i32>} : memref<8x8x512xf32, #tpu.memory_space<vmem>>, vector<8x8x512xf32>,
    %c0_10 = arith.constant 0 : index
    %c0_11 = arith.constant 0 : index
    %12 = vector.load %arg3[%c0_10, %c0_11] : memref<128x512xf32, #tpu.memory_space<vmem>>, vector<128x512xf32>
    %c0_12 = arith.constant 0 : index
    %c0_13 = arith.constant 0 : index
    %13 = vector.load %arg8[%c0_12, %c0_13] : memref<8x128xf32, #tpu.memory_space<vmem>>, vector<8x128xf32>
    %c0_14 = arith.constant 0 : index
    %c0_15 = arith.constant 0 : index
    %14 = vector.load %arg9[%c0_14, %c0_15] : memref<8x128xf32, #tpu.memory_space<vmem>>, vector<8x128xf32>
    %c0_i32_16 = arith.constant 0 : i32
    %15 = arith.index_cast %c0_i32_16 : i32 to index
    %c0_17 = arith.constant 0 : index
    %c0_18 = arith.constant 0 : index
    %16 = vector.load %arg10[%15, %c0_17, %c0_18] : memref<8x8x512xf32, #tpu.memory_space<vmem>>, vector<1x8x512xf32>
    %17 = vector.shape_cast %16 : vector<1x8x512xf32> to vector<8x512xf32>
    %cst_19 = arith.constant dense<0.000000e+00> : vector<8x512xf32>
    %18 = tpu.matmul %13, %12, %cst_19 {dimension_numbers = #tpu.dot_dimension_numbers<[1], [0], [0], [1], [0, 0, 1, 1], [], []>} : vector<8x128xf32>, vector<128x512xf32>, vector<8x512xf32> -> vector<8x512xf32>
    %19 = arith.addf %17, %18 : vector<8x512xf32>
    %20 = vector.extract_strided_slice %19 {offsets = [0, 0], sizes = [8, 384], strides = [1, 1]} : vector<8x512xf32> to vector<8x384xf32>
    %21 = arith.negf %20 : vector<8x384xf32>
    %22 = math.exp %21 : vector<8x384xf32>
    %cst_20 = arith.constant 1.000000e+00 : f32
    %23 = vector.broadcast %cst_20 : f32 to vector<8x384xf32>
    %24 = arith.addf %23, %22 : vector<8x384xf32>
    %25 = arith.divf %23, %24 : vector<8x384xf32>
    %26 = vector.extract_strided_slice %25 {offsets = [0, 0], sizes = [8, 128], strides = [1, 1]} : vector<8x384xf32> to vector<8x128xf32>
    %27 = vector.extract_strided_slice %25 {offsets = [0, 128], sizes = [8, 128], strides = [1, 1]} : vector<8x384xf32> to vector<8x128xf32>
    %28 = vector.extract_strided_slice %25 {offsets = [0, 256], sizes = [8, 128], strides = [1, 1]} : vector<8x384xf32> to vector<8x128xf32>
    %29 = vector.extract_strided_slice %19 {offsets = [0, 384], sizes = [8, 128], strides = [1, 1]} : vector<8x512xf32> to vector<8x128xf32>
    %30 = math.tanh %29 : vector<8x128xf32>
    %31 = arith.mulf %27, %14 : vector<8x128xf32>
    %32 = arith.mulf %26, %30 : vector<8x128xf32>
    %33 = arith.addf %31, %32 : vector<8x128xf32>
    %34 = math.tanh %33 : vector<8x128xf32>
    %35 = arith.mulf %28, %34 : vector<8x128xf32>
    %36 = arith.index_cast %c0_i32_16 : i32 to index
    %c0_21 = arith.constant 0 : index
    %c0_22 = arith.constant 0 : index
    %37 = vector.load %arg11[%36, %c0_21, %c0_22] : memref<8x8x128xf32, #tpu.memory_space<vmem>>, vector<1x8x128xf32>
    %38 = vector.shape_cast %37 : vector<1x8x128xf32> to vector<8x128xf32>
    %39 = vector.shape_cast %35 : vector<8x128xf32> to vector<1x8x128xf32>
    tpu.vector_store %arg11[%36, %c0_21, %c0_22], %39 {strides = array<i32>} : memref<8x8x128xf32, #tpu.memory_space<vmem>>, vector<1x8x128xf32>,
    %c1_i32 = arith.constant 1 : i32
    %40 = arith.index_cast %c1_i32 : i32 to index
    %c0_23 = arith.constant 0 : index
    %c0_24 = arith.constant 0 : index
    %41 = vector.load %arg10[%40, %c0_23, %c0_24] : memref<8x8x512xf32, #tpu.memory_space<vmem>>, vector<1x8x512xf32>
    %42 = vector.shape_cast %41 : vector<1x8x512xf32> to vector<8x512xf32>
    %cst_25 = arith.constant dense<0.000000e+00> : vector<8x512xf32>
    %43 = tpu.matmul %35, %12, %cst_25 {dimension_numbers = #tpu.dot_dimension_numbers<[1], [0], [0], [1], [0, 0, 1, 1], [], []>} : vector<8x128xf32>, vector<128x512xf32>, vector<8x512xf32> -> vector<8x512xf32>
    %44 = arith.addf %42, %43 : vector<8x512xf32>
    %45 = vector.extract_strided_slice %44 {offsets = [0, 0], sizes = [8, 384], strides = [1, 1]} : vector<8x512xf32> to vector<8x384xf32>
    %46 = arith.negf %45 : vector<8x384xf32>
    %47 = math.exp %46 : vector<8x384xf32>
    %cst_26 = arith.constant 1.000000e+00 : f32
    %48 = vector.broadcast %cst_26 : f32 to vector<8x384xf32>
    %49 = arith.addf %48, %47 : vector<8x384xf32>
    %50 = arith.divf %48, %49 : vector<8x384xf32>
    %51 = vector.extract_strided_slice %50 {offsets = [0, 0], sizes = [8, 128], strides = [1, 1]} : vector<8x384xf32> to vector<8x128xf32>
    %52 = vector.extract_strided_slice %50 {offsets = [0, 128], sizes = [8, 128], strides = [1, 1]} : vector<8x384xf32> to vector<8x128xf32>
    %53 = vector.extract_strided_slice %50 {offsets = [0, 256], sizes = [8, 128], strides = [1, 1]} : vector<8x384xf32> to vector<8x128xf32>
    %54 = vector.extract_strided_slice %44 {offsets = [0, 384], sizes = [8, 128], strides = [1, 1]} : vector<8x512xf32> to vector<8x128xf32>
    %55 = math.tanh %54 : vector<8x128xf32>
    %56 = arith.mulf %52, %33 : vector<8x128xf32>
    %57 = arith.mulf %51, %55 : vector<8x128xf32>
    %58 = arith.addf %56, %57 : vector<8x128xf32>
    %59 = math.tanh %58 : vector<8x128xf32>
    %60 = arith.mulf %53, %59 : vector<8x128xf32>
    %61 = arith.index_cast %c1_i32 : i32 to index
    %c0_27 = arith.constant 0 : index
    %c0_28 = arith.constant 0 : index
    %62 = vector.load %arg11[%61, %c0_27, %c0_28] : memref<8x8x128xf32, #tpu.memory_space<vmem>>, vector<1x8x128xf32>
    %63 = vector.shape_cast %62 : vector<1x8x128xf32> to vector<8x128xf32>
    %64 = vector.shape_cast %60 : vector<8x128xf32> to vector<1x8x128xf32>
    tpu.vector_store %arg11[%61, %c0_27, %c0_28], %64 {strides = array<i32>} : memref<8x8x128xf32, #tpu.memory_space<vmem>>, vector<1x8x128xf32>,
    %c2_i32 = arith.constant 2 : i32
    %65 = arith.index_cast %c2_i32 : i32 to index
    %c0_29 = arith.constant 0 : index
    %c0_30 = arith.constant 0 : index
    %66 = vector.load %arg10[%65, %c0_29, %c0_30] : memref<8x8x512xf32, #tpu.memory_space<vmem>>, vector<1x8x512xf32>
    %67 = vector.shape_cast %66 : vector<1x8x512xf32> to vector<8x512xf32>
    %cst_31 = arith.constant dense<0.000000e+00> : vector<8x512xf32>
    %68 = tpu.matmul %60, %12, %cst_31 {dimension_numbers = #tpu.dot_dimension_numbers<[1], [0], [0], [1], [0, 0, 1, 1], [], []>} : vector<8x128xf32>, vector<128x512xf32>, vector<8x512xf32> -> vector<8x512xf32>
    %69 = arith.addf %67, %68 : vector<8x512xf32>
    %70 = vector.extract_strided_slice %69 {offsets = [0, 0], sizes = [8, 384], strides = [1, 1]} : vector<8x512xf32> to vector<8x384xf32>
    %71 = arith.negf %70 : vector<8x384xf32>
    %72 = math.exp %71 : vector<8x384xf32>
    %cst_32 = arith.constant 1.000000e+00 : f32
    %73 = vector.broadcast %cst_32 : f32 to vector<8x384xf32>
    %74 = arith.addf %73, %72 : vector<8x384xf32>
    %75 = arith.divf %73, %74 : vector<8x384xf32>
    %76 = vector.extract_strided_slice %75 {offsets = [0, 0], sizes = [8, 128], strides = [1, 1]} : vector<8x384xf32> to vector<8x128xf32>
    %77 = vector.extract_strided_slice %75 {offsets = [0, 128], sizes = [8, 128], strides = [1, 1]} : vector<8x384xf32> to vector<8x128xf32>
    %78 = vector.extract_strided_slice %75 {offsets = [0, 256], sizes = [8, 128], strides = [1, 1]} : vector<8x384xf32> to vector<8x128xf32>
    %79 = vector.extract_strided_slice %69 {offsets = [0, 384], sizes = [8, 128], strides = [1, 1]} : vector<8x512xf32> to vector<8x128xf32>
    %80 = math.tanh %79 : vector<8x128xf32>
    %81 = arith.mulf %77, %58 : vector<8x128xf32>
    %82 = arith.mulf %76, %80 : vector<8x128xf32>
    %83 = arith.addf %81, %82 : vector<8x128xf32>
    %84 = math.tanh %83 : vector<8x128xf32>
    %85 = arith.mulf %78, %84 : vector<8x128xf32>
    %86 = arith.index_cast %c2_i32 : i32 to index
    %c0_33 = arith.constant 0 : index
    %c0_34 = arith.constant 0 : index
    %87 = vector.load %arg11[%86, %c0_33, %c0_34] : memref<8x8x128xf32, #tpu.memory_space<vmem>>, vector<1x8x128xf32>
    %88 = vector.shape_cast %87 : vector<1x8x128xf32> to vector<8x128xf32>
    %89 = vector.shape_cast %85 : vector<8x128xf32> to vector<1x8x128xf32>
    tpu.vector_store %arg11[%86, %c0_33, %c0_34], %89 {strides = array<i32>} : memref<8x8x128xf32, #tpu.memory_space<vmem>>, vector<1x8x128xf32>,
    %c3_i32 = arith.constant 3 : i32
    %90 = arith.index_cast %c3_i32 : i32 to index
    %c0_35 = arith.constant 0 : index
    %c0_36 = arith.constant 0 : index
    %91 = vector.load %arg10[%90, %c0_35, %c0_36] : memref<8x8x512xf32, #tpu.memory_space<vmem>>, vector<1x8x512xf32>
    %92 = vector.shape_cast %91 : vector<1x8x512xf32> to vector<8x512xf32>
    %cst_37 = arith.constant dense<0.000000e+00> : vector<8x512xf32>
    %93 = tpu.matmul %85, %12, %cst_37 {dimension_numbers = #tpu.dot_dimension_numbers<[1], [0], [0], [1], [0, 0, 1, 1], [], []>} : vector<8x128xf32>, vector<128x512xf32>, vector<8x512xf32> -> vector<8x512xf32>
    %94 = arith.addf %92, %93 : vector<8x512xf32>
    %95 = vector.extract_strided_slice %94 {offsets = [0, 0], sizes = [8, 384], strides = [1, 1]} : vector<8x512xf32> to vector<8x384xf32>
    %96 = arith.negf %95 : vector<8x384xf32>
    %97 = math.exp %96 : vector<8x384xf32>
    %cst_38 = arith.constant 1.000000e+00 : f32
    %98 = vector.broadcast %cst_38 : f32 to vector<8x384xf32>
    %99 = arith.addf %98, %97 : vector<8x384xf32>
    %100 = arith.divf %98, %99 : vector<8x384xf32>
    %101 = vector.extract_strided_slice %100 {offsets = [0, 0], sizes = [8, 128], strides = [1, 1]} : vector<8x384xf32> to vector<8x128xf32>
    %102 = vector.extract_strided_slice %100 {offsets = [0, 128], sizes = [8, 128], strides = [1, 1]} : vector<8x384xf32> to vector<8x128xf32>
    %103 = vector.extract_strided_slice %100 {offsets = [0, 256], sizes = [8, 128], strides = [1, 1]} : vector<8x384xf32> to vector<8x128xf32>
    %104 = vector.extract_strided_slice %94 {offsets = [0, 384], sizes = [8, 128], strides = [1, 1]} : vector<8x512xf32> to vector<8x128xf32>
    %105 = math.tanh %104 : vector<8x128xf32>
    %106 = arith.mulf %102, %83 : vector<8x128xf32>
    %107 = arith.mulf %101, %105 : vector<8x128xf32>
    %108 = arith.addf %106, %107 : vector<8x128xf32>
    %109 = math.tanh %108 : vector<8x128xf32>
    %110 = arith.mulf %103, %109 : vector<8x128xf32>
    %111 = arith.index_cast %c3_i32 : i32 to index
    %c0_39 = arith.constant 0 : index
    %c0_40 = arith.constant 0 : index
    %112 = vector.load %arg11[%111, %c0_39, %c0_40] : memref<8x8x128xf32, #tpu.memory_space<vmem>>, vector<1x8x128xf32>
    %113 = vector.shape_cast %112 : vector<1x8x128xf32> to vector<8x128xf32>
    %114 = vector.shape_cast %110 : vector<8x128xf32> to vector<1x8x128xf32>
    tpu.vector_store %arg11[%111, %c0_39, %c0_40], %114 {strides = array<i32>} : memref<8x8x128xf32, #tpu.memory_space<vmem>>, vector<1x8x128xf32>,
    %c4_i32 = arith.constant 4 : i32
    %115 = arith.index_cast %c4_i32 : i32 to index
    %c0_41 = arith.constant 0 : index
    %c0_42 = arith.constant 0 : index
    %116 = vector.load %arg10[%115, %c0_41, %c0_42] : memref<8x8x512xf32, #tpu.memory_space<vmem>>, vector<1x8x512xf32>
    %117 = vector.shape_cast %116 : vector<1x8x512xf32> to vector<8x512xf32>
    %cst_43 = arith.constant dense<0.000000e+00> : vector<8x512xf32>
    %118 = tpu.matmul %110, %12, %cst_43 {dimension_numbers = #tpu.dot_dimension_numbers<[1], [0], [0], [1], [0, 0, 1, 1], [], []>} : vector<8x128xf32>, vector<128x512xf32>, vector<8x512xf32> -> vector<8x512xf32>
    %119 = arith.addf %117, %118 : vector<8x512xf32>
    %120 = vector.extract_strided_slice %119 {offsets = [0, 0], sizes = [8, 384], strides = [1, 1]} : vector<8x512xf32> to vector<8x384xf32>
    %121 = arith.negf %120 : vector<8x384xf32>
    %122 = math.exp %121 : vector<8x384xf32>
    %cst_44 = arith.constant 1.000000e+00 : f32
    %123 = vector.broadcast %cst_44 : f32 to vector<8x384xf32>
    %124 = arith.addf %123, %122 : vector<8x384xf32>
    %125 = arith.divf %123, %124 : vector<8x384xf32>
    %126 = vector.extract_strided_slice %125 {offsets = [0, 0], sizes = [8, 128], strides = [1, 1]} : vector<8x384xf32> to vector<8x128xf32>
    %127 = vector.extract_strided_slice %125 {offsets = [0, 128], sizes = [8, 128], strides = [1, 1]} : vector<8x384xf32> to vector<8x128xf32>
    %128 = vector.extract_strided_slice %125 {offsets = [0, 256], sizes = [8, 128], strides = [1, 1]} : vector<8x384xf32> to vector<8x128xf32>
    %129 = vector.extract_strided_slice %119 {offsets = [0, 384], sizes = [8, 128], strides = [1, 1]} : vector<8x512xf32> to vector<8x128xf32>
    %130 = math.tanh %129 : vector<8x128xf32>
    %131 = arith.mulf %127, %108 : vector<8x128xf32>
    %132 = arith.mulf %126, %130 : vector<8x128xf32>
    %133 = arith.addf %131, %132 : vector<8x128xf32>
    %134 = math.tanh %133 : vector<8x128xf32>
    %135 = arith.mulf %128, %134 : vector<8x128xf32>
    %136 = arith.index_cast %c4_i32 : i32 to index
    %c0_45 = arith.constant 0 : index
    %c0_46 = arith.constant 0 : index
    %137 = vector.load %arg11[%136, %c0_45, %c0_46] : memref<8x8x128xf32, #tpu.memory_space<vmem>>, vector<1x8x128xf32>
    %138 = vector.shape_cast %137 : vector<1x8x128xf32> to vector<8x128xf32>
    %139 = vector.shape_cast %135 : vector<8x128xf32> to vector<1x8x128xf32>
    tpu.vector_store %arg11[%136, %c0_45, %c0_46], %139 {strides = array<i32>} : memref<8x8x128xf32, #tpu.memory_space<vmem>>, vector<1x8x128xf32>,
    %c5_i32 = arith.constant 5 : i32
    %140 = arith.index_cast %c5_i32 : i32 to index
    %c0_47 = arith.constant 0 : index
    %c0_48 = arith.constant 0 : index
    %141 = vector.load %arg10[%140, %c0_47, %c0_48] : memref<8x8x512xf32, #tpu.memory_space<vmem>>, vector<1x8x512xf32>
    %142 = vector.shape_cast %141 : vector<1x8x512xf32> to vector<8x512xf32>
    %cst_49 = arith.constant dense<0.000000e+00> : vector<8x512xf32>
    %143 = tpu.matmul %135, %12, %cst_49 {dimension_numbers = #tpu.dot_dimension_numbers<[1], [0], [0], [1], [0, 0, 1, 1], [], []>} : vector<8x128xf32>, vector<128x512xf32>, vector<8x512xf32> -> vector<8x512xf32>
    %144 = arith.addf %142, %143 : vector<8x512xf32>
    %145 = vector.extract_strided_slice %144 {offsets = [0, 0], sizes = [8, 384], strides = [1, 1]} : vector<8x512xf32> to vector<8x384xf32>
    %146 = arith.negf %145 : vector<8x384xf32>
    %147 = math.exp %146 : vector<8x384xf32>
    %cst_50 = arith.constant 1.000000e+00 : f32
    %148 = vector.broadcast %cst_50 : f32 to vector<8x384xf32>
    %149 = arith.addf %148, %147 : vector<8x384xf32>
    %150 = arith.divf %148, %149 : vector<8x384xf32>
    %151 = vector.extract_strided_slice %150 {offsets = [0, 0], sizes = [8, 128], strides = [1, 1]} : vector<8x384xf32> to vector<8x128xf32>
    %152 = vector.extract_strided_slice %150 {offsets = [0, 128], sizes = [8, 128], strides = [1, 1]} : vector<8x384xf32> to vector<8x128xf32>
    %153 = vector.extract_strided_slice %150 {offsets = [0, 256], sizes = [8, 128], strides = [1, 1]} : vector<8x384xf32> to vector<8x128xf32>
    %154 = vector.extract_strided_slice %144 {offsets = [0, 384], sizes = [8, 128], strides = [1, 1]} : vector<8x512xf32> to vector<8x128xf32>
    %155 = math.tanh %154 : vector<8x128xf32>
    %156 = arith.mulf %152, %133 : vector<8x128xf32>
    %157 = arith.mulf %151, %155 : vector<8x128xf32>
    %158 = arith.addf %156, %157 : vector<8x128xf32>
    %159 = math.tanh %158 : vector<8x128xf32>
    %160 = arith.mulf %153, %159 : vector<8x128xf32>
    %161 = arith.index_cast %c5_i32 : i32 to index
    %c0_51 = arith.constant 0 : index
    %c0_52 = arith.constant 0 : index
    %162 = vector.load %arg11[%161, %c0_51, %c0_52] : memref<8x8x128xf32, #tpu.memory_space<vmem>>, vector<1x8x128xf32>
    %163 = vector.shape_cast %162 : vector<1x8x128xf32> to vector<8x128xf32>
    %164 = vector.shape_cast %160 : vector<8x128xf32> to vector<1x8x128xf32>
    tpu.vector_store %arg11[%161, %c0_51, %c0_52], %164 {strides = array<i32>} : memref<8x8x128xf32, #tpu.memory_space<vmem>>, vector<1x8x128xf32>,
    %c6_i32 = arith.constant 6 : i32
    %165 = arith.index_cast %c6_i32 : i32 to index
    %c0_53 = arith.constant 0 : index
    %c0_54 = arith.constant 0 : index
    %166 = vector.load %arg10[%165, %c0_53, %c0_54] : memref<8x8x512xf32, #tpu.memory_space<vmem>>, vector<1x8x512xf32>
    %167 = vector.shape_cast %166 : vector<1x8x512xf32> to vector<8x512xf32>
    %cst_55 = arith.constant dense<0.000000e+00> : vector<8x512xf32>
    %168 = tpu.matmul %160, %12, %cst_55 {dimension_numbers = #tpu.dot_dimension_numbers<[1], [0], [0], [1], [0, 0, 1, 1], [], []>} : vector<8x128xf32>, vector<128x512xf32>, vector<8x512xf32> -> vector<8x512xf32>
    %169 = arith.addf %167, %168 : vector<8x512xf32>
    %170 = vector.extract_strided_slice %169 {offsets = [0, 0], sizes = [8, 384], strides = [1, 1]} : vector<8x512xf32> to vector<8x384xf32>
    %171 = arith.negf %170 : vector<8x384xf32>
    %172 = math.exp %171 : vector<8x384xf32>
    %cst_56 = arith.constant 1.000000e+00 : f32
    %173 = vector.broadcast %cst_56 : f32 to vector<8x384xf32>
    %174 = arith.addf %173, %172 : vector<8x384xf32>
    %175 = arith.divf %173, %174 : vector<8x384xf32>
    %176 = vector.extract_strided_slice %175 {offsets = [0, 0], sizes = [8, 128], strides = [1, 1]} : vector<8x384xf32> to vector<8x128xf32>
    %177 = vector.extract_strided_slice %175 {offsets = [0, 128], sizes = [8, 128], strides = [1, 1]} : vector<8x384xf32> to vector<8x128xf32>
    %178 = vector.extract_strided_slice %175 {offsets = [0, 256], sizes = [8, 128], strides = [1, 1]} : vector<8x384xf32> to vector<8x128xf32>
    %179 = vector.extract_strided_slice %169 {offsets = [0, 384], sizes = [8, 128], strides = [1, 1]} : vector<8x512xf32> to vector<8x128xf32>
    %180 = math.tanh %179 : vector<8x128xf32>
    %181 = arith.mulf %177, %158 : vector<8x128xf32>
    %182 = arith.mulf %176, %180 : vector<8x128xf32>
    %183 = arith.addf %181, %182 : vector<8x128xf32>
    %184 = math.tanh %183 : vector<8x128xf32>
    %185 = arith.mulf %178, %184 : vector<8x128xf32>
    %186 = arith.index_cast %c6_i32 : i32 to index
    %c0_57 = arith.constant 0 : index
    %c0_58 = arith.constant 0 : index
    %187 = vector.load %arg11[%186, %c0_57, %c0_58] : memref<8x8x128xf32, #tpu.memory_space<vmem>>, vector<1x8x128xf32>
    %188 = vector.shape_cast %187 : vector<1x8x128xf32> to vector<8x128xf32>
    %189 = vector.shape_cast %185 : vector<8x128xf32> to vector<1x8x128xf32>
    tpu.vector_store %arg11[%186, %c0_57, %c0_58], %189 {strides = array<i32>} : memref<8x8x128xf32, #tpu.memory_space<vmem>>, vector<1x8x128xf32>,
    %c7_i32 = arith.constant 7 : i32
    %190 = arith.index_cast %c7_i32 : i32 to index
    %c0_59 = arith.constant 0 : index
    %c0_60 = arith.constant 0 : index
    %191 = vector.load %arg10[%190, %c0_59, %c0_60] : memref<8x8x512xf32, #tpu.memory_space<vmem>>, vector<1x8x512xf32>
    %192 = vector.shape_cast %191 : vector<1x8x512xf32> to vector<8x512xf32>
    %cst_61 = arith.constant dense<0.000000e+00> : vector<8x512xf32>
    %193 = tpu.matmul %185, %12, %cst_61 {dimension_numbers = #tpu.dot_dimension_numbers<[1], [0], [0], [1], [0, 0, 1, 1], [], []>} : vector<8x128xf32>, vector<128x512xf32>, vector<8x512xf32> -> vector<8x512xf32>
    %194 = arith.addf %192, %193 : vector<8x512xf32>
    %195 = vector.extract_strided_slice %194 {offsets = [0, 0], sizes = [8, 384], strides = [1, 1]} : vector<8x512xf32> to vector<8x384xf32>
    %196 = arith.negf %195 : vector<8x384xf32>
    %197 = math.exp %196 : vector<8x384xf32>
    %cst_62 = arith.constant 1.000000e+00 : f32
    %198 = vector.broadcast %cst_62 : f32 to vector<8x384xf32>
    %199 = arith.addf %198, %197 : vector<8x384xf32>
    %200 = arith.divf %198, %199 : vector<8x384xf32>
    %201 = vector.extract_strided_slice %200 {offsets = [0, 0], sizes = [8, 128], strides = [1, 1]} : vector<8x384xf32> to vector<8x128xf32>
    %202 = vector.extract_strided_slice %200 {offsets = [0, 128], sizes = [8, 128], strides = [1, 1]} : vector<8x384xf32> to vector<8x128xf32>
    %203 = vector.extract_strided_slice %200 {offsets = [0, 256], sizes = [8, 128], strides = [1, 1]} : vector<8x384xf32> to vector<8x128xf32>
    %204 = vector.extract_strided_slice %194 {offsets = [0, 384], sizes = [8, 128], strides = [1, 1]} : vector<8x512xf32> to vector<8x128xf32>
    %205 = math.tanh %204 : vector<8x128xf32>
    %206 = arith.mulf %202, %183 : vector<8x128xf32>
    %207 = arith.mulf %201, %205 : vector<8x128xf32>
    %208 = arith.addf %206, %207 : vector<8x128xf32>
    %209 = math.tanh %208 : vector<8x128xf32>
    %210 = arith.mulf %203, %209 : vector<8x128xf32>
    %211 = arith.index_cast %c7_i32 : i32 to index
    %c0_63 = arith.constant 0 : index
    %c0_64 = arith.constant 0 : index
    %212 = vector.load %arg11[%211, %c0_63, %c0_64] : memref<8x8x128xf32, #tpu.memory_space<vmem>>, vector<1x8x128xf32>
    %213 = vector.shape_cast %212 : vector<1x8x128xf32> to vector<8x128xf32>
    %214 = vector.shape_cast %210 : vector<8x128xf32> to vector<1x8x128xf32>
    tpu.vector_store %arg11[%211, %c0_63, %c0_64], %214 {strides = array<i32>} : memref<8x8x128xf32, #tpu.memory_space<vmem>>, vector<1x8x128xf32>,
    %c8_i32 = arith.constant 8 : i32
    %c0_65 = arith.constant 0 : index
    %c0_66 = arith.constant 0 : index
    %215 = vector.load %arg8[%c0_65, %c0_66] : memref<8x128xf32, #tpu.memory_space<vmem>>, vector<8x128xf32>
    tpu.vector_store %arg8[%c0_65, %c0_66], %210 {strides = array<i32>} : memref<8x128xf32, #tpu.memory_space<vmem>>, vector<8x128xf32>,
    %c0_67 = arith.constant 0 : index
    %c0_68 = arith.constant 0 : index
    %216 = vector.load %arg9[%c0_67, %c0_68] : memref<8x128xf32, #tpu.memory_space<vmem>>, vector<8x128xf32>
    tpu.vector_store %arg9[%c0_67, %c0_68], %208 {strides = array<i32>} : memref<8x128xf32, #tpu.memory_space<vmem>>, vector<8x128xf32>,
    %c0_69 = arith.constant 0 : index
    %c0_70 = arith.constant 0 : index
    %c0_71 = arith.constant 0 : index
    %217 = vector.load %arg11[%c0_69, %c0_70, %c0_71] : memref<8x8x128xf32, #tpu.memory_space<vmem>>, vector<8x8x128xf32>
    %218 = vector.shape_cast %217 : vector<8x8x128xf32> to vector<64x128xf32>
    %c0_72 = arith.constant 0 : index
    %c0_73 = arith.constant 0 : index
    %219 = vector.load %arg5[%c0_72, %c0_73] : memref<128x2xf32, #tpu.memory_space<vmem>>, vector<128x2xf32>
    %cst_74 = arith.constant dense<0.000000e+00> : vector<64x2xf32>
    %220 = tpu.matmul %218, %219, %cst_74 {dimension_numbers = #tpu.dot_dimension_numbers<[1], [0], [0], [1], [0, 0, 1, 1], [], []>} : vector<64x128xf32>, vector<128x2xf32>, vector<64x2xf32> -> vector<64x2xf32>
    %c0_75 = arith.constant 0 : index
    %c0_76 = arith.constant 0 : index
    %221 = vector.load %arg6[%c0_75, %c0_76] : memref<1x2xf32, #tpu.memory_space<vmem>>, vector<1x2xf32>
    %222 = vector.broadcast %221 : vector<1x2xf32> to vector<64x2xf32>
    %223 = arith.addf %220, %222 : vector<64x2xf32>
    %224 = arith.negf %223 : vector<64x2xf32>
    %225 = math.exp %224 : vector<64x2xf32>
    %cst_77 = arith.constant 1.000000e+00 : f32
    %226 = vector.broadcast %cst_77 : f32 to vector<64x2xf32>
    %227 = arith.addf %226, %225 : vector<64x2xf32>
    %228 = arith.divf %226, %227 : vector<64x2xf32>
    %229 = vector.shape_cast %228 : vector<64x2xf32> to vector<8x8x2xf32>
    %c0_78 = arith.constant 0 : index
    %c0_79 = arith.constant 0 : index
    %c0_80 = arith.constant 0 : index
    %230 = vector.load %arg7[%c0_78, %c0_79, %c0_80] : memref<8x8x2xf32, #tpu.memory_space<vmem>>, vector<8x8x2xf32>
    tpu.vector_store %arg7[%c0_78, %c0_79, %c0_80], %229 {strides = array<i32>} : memref<8x8x2xf32, #tpu.memory_space<vmem>>, vector<8x8x2xf32>,
    return
  }
  func.func @transform_0(%arg0: i32) -> (i32, i32, i32) {
    %c0_i32 = arith.constant 0 : i32
    %c0_i32_0 = arith.constant 0 : i32
    %c0_i32_1 = arith.constant 0 : i32
    return %arg0, %c0_i32, %c0_i32_0 : i32, i32, i32
  }
  func.func @transform_1(%arg0: i32) -> (i32, i32) {
    %c0_i32 = arith.constant 0 : i32
    %c0_i32_0 = arith.constant 0 : i32
    %c0_i32_1 = arith.constant 0 : i32
    return %c0_i32, %c0_i32_0 : i32, i32
  }
  func.func @transform_2(%arg0: i32) -> (i32, i32) {
    %c0_i32 = arith.constant 0 : i32
    %c0_i32_0 = arith.constant 0 : i32
    %c0_i32_1 = arith.constant 0 : i32
    return %c0_i32, %c0_i32_0 : i32, i32
  }
  func.func @transform_3(%arg0: i32) -> (i32, i32) {
    %c0_i32 = arith.constant 0 : i32
    %c0_i32_0 = arith.constant 0 : i32
    %c0_i32_1 = arith.constant 0 : i32
    return %c0_i32, %c0_i32_0 : i32, i32
  }
  func.func @transform_4(%arg0: i32) -> (i32, i32) {
    %c0_i32 = arith.constant 0 : i32
    %c0_i32_0 = arith.constant 0 : i32
    %c0_i32_1 = arith.constant 0 : i32
    return %c0_i32, %c0_i32_0 : i32, i32
  }
  func.func @transform_5(%arg0: i32) -> (i32, i32) {
    %c0_i32 = arith.constant 0 : i32
    %c0_i32_0 = arith.constant 0 : i32
    %c0_i32_1 = arith.constant 0 : i32
    return %c0_i32, %c0_i32_0 : i32, i32
  }
  func.func @transform_6(%arg0: i32) -> (i32, i32, i32) {
    %c0_i32 = arith.constant 0 : i32
    %c0_i32_0 = arith.constant 0 : i32
    %c0_i32_1 = arith.constant 0 : i32
    return %arg0, %c0_i32, %c0_i32_0 : i32, i32, i32
  }
}

</mosaic_0001>

<bundles_post_ra>
// kernel: tpu_custom_call.1
= control target key start
LH: loop header
LB: loop body
LE: loop exit
PB: predicated region body
PF: predicated region fallthrough
CT: control target
= control target key end

     0   :  { %11 = vsyncpa [#allocation7], 0  ;;  %s2965_s21 = smov [#allocation6]   ;;  %s3648_s0 = inlined_call_operand.vmem [shape: f32[8,8,16], index: 0, kind: input, shape index: {}]   ;;  %s3649_s1 = inlined_call_operand.vmem [shape: f32[16,512], index: 1, kind: input, shape index: {}]   ;;  %s3650_s2 = inlined_call_operand.hbm [shape: f32[128,512], index: 2, kind: input, shape index: {}]   ;;  %s3651_s3 = inlined_call_operand.vmem [shape: f32[1,512], index: 3, kind: input, shape index: {}]   ;;  %s3652_s4 = inlined_call_operand.vmem [shape: f32[128,2], index: 4, kind: input, shape index: {}]   ;;  %s3653_s5 = inlined_call_operand.vmem [shape: f32[1,2], index: 5, kind: input, shape index: {}]   ;;  %s3654_s6 = inlined_call_operand.vmem [shape: f32[8,8,2], index: 6, kind: output, shape index: {}]  }
   0x1   :  { %s21_s22 = sshll.u32 %s2965_s21, 4  ;;  %s2941_s25 = scalar_lea.hbm %s3650_s2, 8192  ;;  %s22_s22 = int_to_ptr.vmem [resolvable:$true] %s21_s22 }
   0x2   :  { %p2942_p0 = scmp.ne.s32.totalorder %s3650_s2, %s2941_s25  ;;  %p2945_p1 = scmp.lt.u32.totalorder %s2941_s25, %s3650_s2 }
   0x4   :  { %p2947_p2 = pnand %p2945_p1, %p2942_p0 }
   0x6   :  { %2950 = shalt.err (!%p2947_p2)
}
   0x7   :  { %s2951_s30 = scalar_lea.vmem %s22_s22, 8192  ;;  %p2956_p4 = scmp.lt.s32.totalorder %s22_s22, %s22_s22 }
   0x8   :  { %p2952_p3 = scmp.ne.s32.totalorder %s22_s22, %s2951_s30  ;;  %p2957_p5 = scmp.lt.s32.totalorder %s2951_s30, %s2951_s30 }
   0xa   :  { %p2958_p6 = por %p2957_p5, %p2956_p4 }
   0xc   :  { %p2959_p7 = pnand %p2958_p6, %p2952_p3 }
   0xe   :  { %2962 = shalt.err (!%p2959_p7)
}
   0xf   :  { %s2966_s7 = smov 512   ;;  %s2967_s8 = smov 32  }
  0x10   :  { %27 = dma.hbm_to_vmem [thread:$0]  %s3650_s2, 8192, %s22_s22, [#allocation7], %s2966_s7, %s2966_s7, %s2967_s8  }
  0x11   :  { %2963 = dma.done.wait [#allocation7], 8192  }
  0x12   :  { %2964 = vsyncadd [#allocation7], 4294959104  ;;  %v2968_v0 = vmov 0.0   ;;  %v54_v1 = vld [vmem:[%s3649_s1 + $0x18] sm:$0xff]  ;;  %v53_v3 = vld [vmem:[%s3649_s1 + $0x10] sm:$0xff]  ;;  %vm81_vm0 = vcmask 130048  }
  0x13   :  { %283 = vmatprep.mubr.f32.mxu1 %v2968_v0  ;;  %170 = vmatprep.mubr.f32.mxu0 %v2968_v0  ;;  %v58_v2 = vld [vmem:[%s3649_s1 + $0x38] sm:$0xff]  ;;  %v57_v5 = vld [vmem:[%s3649_s1 + $0x30] sm:$0xff]  ;;  %v365_v6 = vld [vmem:[#allocation6 + $0x8] sm:$0xff]  ;;  %vm2030_vm1 = vcmask 15360  }
  0x14   :  { %v2165_v4 = vpack.c.bf16 %v58_v2, %v54_v1  ;;  %v2167_v7 = vpack.c.bf16 %v57_v5, %v53_v3  ;;  %v369_v8 = vld [vmem:[#allocation6 + $0x28] sm:$0xff]  ;;  %v364_v9 = vld [vmem:[#allocation6] sm:$0xff]  ;;  %v3060_v28 = vld [vmem:[%s3648_s0 + $0x10] sm:$0xff] }
  0x15   :  { %v368_v10 = vld [vmem:[#allocation6 + $0x20] sm:$0xff]  ;;  %v3030_v11 = vpack.c.bf16 %v369_v8, %v365_v6  ;;  %v373_v12 = vld [vmem:[#allocation6 + $0x48] sm:$0xff]  ;;  %v3086_v41 = vld [vmem:[%s3648_s0 + $0x18] sm:$0xff] }
  0x16   :  { %2166 = vmatprep.subr.bf16.mxu1 %v2165_v4  ;;  %v377_v13 = vld [vmem:[#allocation6 + $0x68] sm:$0xff]  ;;  %v43_v14 = vld [vmem:[%s3648_s0] sm:$0xff]  ;;  %v3035_v15 = vpack.c.bf16 %v368_v10, %v364_v9  ;;  %v49_v62 = vld [vmem:[%s3648_s0 + $0x30] sm:$0xff] }
  0x17   :  { %2168 = vmatpush1.bf16.msra.mxu1 %v2167_v7  ;;  %v3038_v16 = vpack.c.bf16 %v377_v13, %v373_v12  ;;  %v372_v17 = vld [vmem:[#allocation6 + $0x40] sm:$0xff]  ;;  %v381_v19 = vld [vmem:[#allocation6 + $0x88] sm:$0xff]  ;;  %v367_v4 = vld [vmem:[#allocation6 + $0x18] sm:$0xff] }
  0x18   :  { %2170 = vmatprep.subr.bf16.mxu1 %v3030_v11  ;;  %v376_v18 = vld [vmem:[#allocation6 + $0x60] sm:$0xff]  ;;  %v385_v20 = vld [vmem:[#allocation6 + $0xa8] sm:$0xff]  ;;  %v371_v5 = vld [vmem:[#allocation6 + $0x38] sm:$0xff] }
  0x19   :  { %v3046_v21 = vld [vmem:[%s3648_s0 + $0x8] sm:$0xff]  ;;  %v3048_v22 = vpack.c.bf16 %v376_v18, %v372_v17  ;;  %v3051_v23 = vpack.c.bf16 %v385_v20, %v381_v19  ;;  %v380_v24 = vld [vmem:[#allocation6 + $0x80] sm:$0xff]  ;;  %v50_v6 = vld [vmem:[%s3648_s0 + $0x38] sm:$0xff]  ;;  %v3157_v8 = vpack.c.bf16 %v371_v5, %v367_v4 }
  0x1a   :  { %2052 = vmatmul.mubr.msk.f32.vlgmr.msra.gmra.mrb[0].mxu1 %vm81_vm0, %v43_v14  ;;  %v384_v25 = vld [vmem:[#allocation6 + $0xa0] sm:$0xff]  ;;  %v389_v26 = vld [vmem:[#allocation6 + $0xc8] sm:$0xff]  ;;  %v366_v9 = vld [vmem:[#allocation6 + $0x10] sm:$0xff] }
  0x1b   :  { %2172 = vmatpush1.bf16.msra.mxu1 %v3035_v15  ;;  %289 = vmatprep.mubr.f32.mxu1 %v2968_v0  ;;  %v393_v27 = vld [vmem:[#allocation6 + $0xe8] sm:$0xff]  ;;  %v3062_v29 = vpack.c.bf16 %v384_v25, %v380_v24  ;;  %v388_v30 = vld [vmem:[#allocation6 + $0xc0] sm:$0xff]  ;;  %v370_v10 = vld [vmem:[#allocation6 + $0x30] sm:$0xff] }
  0x1c   :  { %2174 = vmatprep.subr.bf16.mxu1 %v3038_v16  ;;  %v392_v31 = vld [vmem:[#allocation6 + $0xe0] sm:$0xff]  ;;  %v3065_v32 = vpack.c.bf16 %v393_v27, %v389_v26  ;;  %v52_v33 = vld [vmem:[%s3649_s1 + $0x8] sm:$0xff]  ;;  %v375_v12 = vld [vmem:[#allocation6 + $0x58] sm:$0xff] }
  0x1d   :  { %v56_v34 = vld [vmem:[%s3649_s1 + $0x28] sm:$0xff]  ;;  %v51_v35 = vld [vmem:[%s3649_s1] sm:$0xff]  ;;  %v3088_v42 = vpack.c.bf16 %v392_v31, %v388_v30  ;;  %v379_v13 = vld [vmem:[#allocation6 + $0x78] sm:$0xff] }
  0x1e   :  { %2053 = vmatmul.mubr.msk.f32.gmra.mrb[2].mxu1 %vm81_vm0, %v3046_v21  ;;  %v397_v36 = vld [vmem:[#allocation6 + $0x108] sm:$0xff]  ;;  %v2161_v38 = vpack.c.bf16 %v56_v34, %v52_v33  ;;  %v55_v39 = vld [vmem:[%s3649_s1 + $0x20] sm:$0xff]  ;;  %v3170_v17 = vpack.c.bf16 %v379_v13, %v375_v12  ;;  %v374_v18 = vld [vmem:[#allocation6 + $0x50] sm:$0xff] }
  0x1f   :  { %2176 = vmatpush1.bf16.msra.mxu1 %v3048_v22  ;;  %295 = vmatprep.mubr.f32.mxu1 %v2968_v0  ;;  %v401_v37 = vld [vmem:[#allocation6 + $0x128] sm:$0xff]  ;;  %v2163_v40 = vpack.c.bf16 %v55_v39, %v51_v35  ;;  %v396_v44 = vld [vmem:[#allocation6 + $0x100] sm:$0xff]  ;;  %v378_v19 = vld [vmem:[#allocation6 + $0x70] sm:$0xff] }
  0x20   :  { %2178 = vmatprep.subr.bf16.mxu1 %v3051_v23  ;;  %v3091_v43 = vpack.c.bf16 %v401_v37, %v397_v36  ;;  %v400_v45 = vld [vmem:[#allocation6 + $0x120] sm:$0xff]  ;;  %2162 = vmatprep.subr.bf16.mxu0 %v2161_v38  ;;  %v405_v46 = vld [vmem:[#allocation6 + $0x148] sm:$0xff]  ;;  %v383_v20 = vld [vmem:[#allocation6 + $0x98] sm:$0xff]  ;;  %v3179_v24 = vpack.c.bf16 %v378_v19, %v374_v18 }
  0x21   :  { %v409_v47 = vld [vmem:[#allocation6 + $0x168] sm:$0xff]  ;;  %2164 = vmatpush1.bf16.msra.mxu0 %v2163_v40  ;;  %v3101_v48 = vld [vmem:[%s3648_s0 + $0x20] sm:$0xff]  ;;  %v3103_v49 = vpack.c.bf16 %v400_v45, %v396_v44  ;;  %v382_v26 = vld [vmem:[#allocation6 + $0x90] sm:$0xff] }
  0x22   :  { %2054 = vmatmul.mubr.msk.f32.gmra.mrb[4].mxu1 %vm81_vm0, %v3060_v28  ;;  %2234 = vmatprep.subr.bf16.mxu0 %v3030_v11  ;;  %v3106_v50 = vpack.c.bf16 %v409_v47, %v405_v46  ;;  %v404_v51 = vld [vmem:[#allocation6 + $0x140] sm:$0xff]  ;;  %v413_v53 = vld [vmem:[#allocation6 + $0x188] sm:$0xff]  ;;  %v386_v27 = vld [vmem:[#allocation6 + $0xb0] sm:$0xff] }
  0x23   :  { %2180 = vmatpush1.bf16.msra.mxu1 %v3062_v29  ;;  %301 = vmatprep.mubr.f32.mxu1 %v2968_v0  ;;  %v408_v52 = vld [vmem:[#allocation6 + $0x160] sm:$0xff]  ;;  %v417_v54 = vld [vmem:[#allocation6 + $0x1a8] sm:$0xff]  ;;  %v395_v30 = vld [vmem:[#allocation6 + $0xf8] sm:$0xff]  ;;  %v3191_v31 = vpack.c.bf16 %v386_v27, %v382_v26 }
  0x24   :  { %2182 = vmatprep.subr.bf16.mxu1 %v3065_v32  ;;  %2044 = vmatmul.mubr.msk.f32.vlgmr.msra.gmra.mrb[0].mxu0 %vm81_vm0, %v43_v14  ;;  %v3119_v55 = vld [vmem:[%s3648_s0 + $0x28] sm:$0xff]  ;;  %v3121_v56 = vpack.c.bf16 %v408_v52, %v404_v51  ;;  %v3124_v57 = vpack.c.bf16 %v417_v54, %v413_v53  ;;  %v412_v58 = vld [vmem:[#allocation6 + $0x180] sm:$0xff]  ;;  %v3167_v14 = vpack.c.bf16 %v370_v10, %v366_v9  ;;  %v390_v34 = vld [vmem:[#allocation6 + $0xd0] sm:$0xff] }
  0x25   :  { %2236 = vmatpush1.bf16.msra.mxu0 %v3035_v15  ;;  %176 = vmatprep.mubr.f32.mxu0 %v2968_v0  ;;  %v416_v59 = vld [vmem:[#allocation6 + $0x1a0] sm:$0xff]  ;;  %v421_v60 = vld [vmem:[#allocation6 + $0x1c8] sm:$0xff]  ;;  %v394_v35 = vld [vmem:[#allocation6 + $0xf0] sm:$0xff] }
  0x26   :  { %2055 = vmatmul.mubr.msk.f32.gmra.mrb[6].mxu1 %vm81_vm0, %v3086_v41  ;;  %2238 = vmatprep.subr.bf16.mxu0 %v3038_v16  ;;  %v425_v61 = vld [vmem:[#allocation6 + $0x1e8] sm:$0xff]  ;;  %v3138_v63 = vpack.c.bf16 %v416_v59, %v412_v58  ;;  %v420_v2 = vld [vmem:[#allocation6 + $0x1c0] sm:$0xff]  ;;  %v399_v36 = vld [vmem:[#allocation6 + $0x118] sm:$0xff]  ;;  %v3201_v38 = vpack.c.bf16 %v394_v35, %v390_v34 }
  0x27   :  { %2184 = vmatpush1.bf16.msra.mxu1 %v3088_v42  ;;  %307 = vmatprep.mubr.f32.mxu1 %v2968_v0  ;;  %v3141_v1 = vpack.c.bf16 %v425_v61, %v421_v60  ;;  %v424_v3 = vld [vmem:[#allocation6 + $0x1e0] sm:$0xff]  ;;  %v403_v37 = vld [vmem:[#allocation6 + $0x138] sm:$0xff]  ;;  %v398_v40 = vld [vmem:[#allocation6 + $0x110] sm:$0xff] }
  0x28   :  { %2186 = vmatprep.subr.bf16.mxu1 %v3091_v43  ;;  %2045 = vmatmul.mubr.msk.f32.gmra.mrb[2].mxu0 %vm81_vm0, %v3046_v21  ;;  %v3154_v7 = vpack.c.bf16 %v424_v3, %v420_v2  ;;  %v387_v21 = vld [vmem:[#allocation6 + $0xb8] sm:$0xff]  ;;  %v3204_v39 = vpack.c.bf16 %v403_v37, %v399_v36  ;;  %v410_v51 = vld [vmem:[#allocation6 + $0x170] sm:$0xff]  ;;  %v59_v18 = vld [vmem:[%s3651_s3] sm:$0xf] }
  0x29   :  { %2240 = vmatpush1.bf16.msra.mxu0 %v3048_v22  ;;  %182 = vmatprep.mubr.f32.mxu0 %v2968_v0  ;;  %v3183_v25 = vpack.c.bf16 %v387_v21, %v383_v20  ;;  %v407_v44 = vld [vmem:[#allocation6 + $0x158] sm:$0xff]  ;;  %v414_v58 = vld [vmem:[#allocation6 + $0x190] sm:$0xff] }
  0x2a   :  { %2056 = vmatmul.mubr.msk.f32.gmra.mrb[8].mxu1 %vm81_vm0, %v3101_v48  ;;  %2242 = vmatprep.subr.bf16.mxu0 %v3051_v23  ;;  %v411_v45 = vld [vmem:[#allocation6 + $0x178] sm:$0xff]  ;;  %v418_v59 = vld [vmem:[#allocation6 + $0x1b0] sm:$0xff] }
  0x2b   :  { %2188 = vmatpush1.bf16.msra.mxu1 %v3103_v49  ;;  %313 = vmatprep.mubr.f32.mxu1 %v2968_v0  ;;  %v3214_v47 = vpack.c.bf16 %v411_v45, %v407_v44  ;;  %v415_v52 = vld [vmem:[#allocation6 + $0x198] sm:$0xff]  ;;  %v422_v3 = vld [vmem:[#allocation6 + $0x1d0] sm:$0xff] }
  0x2c   :  { %2190 = vmatprep.subr.bf16.mxu1 %v3106_v50  ;;  %2046 = vmatmul.mubr.msk.f32.gmra.mrb[4].mxu0 %vm81_vm0, %v3060_v28  ;;  %v391_v28 = vld [vmem:[#allocation6 + $0xd8] sm:$0xff]  ;;  %v426_v4 = vld [vmem:[#allocation6 + $0x1f0] sm:$0xff] }
  0x2d   :  { %2244 = vmatpush1.bf16.msra.mxu0 %v3062_v29  ;;  %188 = vmatprep.mubr.f32.mxu0 %v2968_v0  ;;  %v3194_v33 = vpack.c.bf16 %v395_v30, %v391_v28  ;;  %v419_v53 = vld [vmem:[#allocation6 + $0x1b8] sm:$0xff]  ;;  %v3229_v5 = vpack.c.bf16 %v426_v4, %v422_v3 }
  0x2e   :  { %2057 = vmatmul.mubr.msk.f32.gmra.mrb[10].mxu1 %vm81_vm0, %v3119_v55  ;;  %2246 = vmatprep.subr.bf16.mxu0 %v3065_v32  ;;  %v423_v60 = vld [vmem:[#allocation6 + $0x1d8] sm:$0xff] }
  0x2f   :  { %2192 = vmatpush1.bf16.msra.mxu1 %v3121_v56  ;;  %319 = vmatprep.mubr.f32.mxu1 %v2968_v0  ;;  %v427_v61 = vld [vmem:[#allocation6 + $0x1f8] sm:$0xff] }
  0x30   :  { %2194 = vmatprep.subr.bf16.mxu1 %v3124_v57  ;;  %2047 = vmatmul.mubr.msk.f32.gmra.mrb[6].mxu0 %vm81_vm0, %v3086_v41  ;;  %v402_v41 = vld [vmem:[#allocation6 + $0x130] sm:$0xff]  ;;  %v3226_v2 = vpack.c.bf16 %v427_v61, %v423_v60 }
  0x31   :  { %2248 = vmatpush1.bf16.msra.mxu0 %v3088_v42  ;;  %194 = vmatprep.mubr.f32.mxu0 %v2968_v0  ;;  %v3211_v46 = vpack.c.bf16 %v402_v41, %v398_v40 }
  0x32   :  { %2058 = vmatmul.mubr.msk.f32.gmra.mrb[12].mxu1 %vm81_vm0, %v49_v62  ;;  %2250 = vmatprep.subr.bf16.mxu0 %v3091_v43 }
  0x33   :  { %2196 = vmatpush1.bf16.msra.mxu1 %v3138_v63  ;;  %325 = vmatprep.mubr.f32.mxu1 %v2968_v0 }
  0x34   :  { %2198 = vmatprep.subr.bf16.mxu1 %v3141_v1  ;;  %2048 = vmatmul.mubr.msk.f32.gmra.mrb[8].mxu0 %vm81_vm0, %v3101_v48  ;;  %v406_v48 = vld [vmem:[#allocation6 + $0x150] sm:$0xff] }
  0x35   :  { %2252 = vmatpush1.bf16.msra.mxu0 %v3103_v49  ;;  %200 = vmatprep.mubr.f32.mxu0 %v2968_v0  ;;  %v3217_v54 = vpack.c.bf16 %v410_v51, %v406_v48 }
  0x36   :  { %2059 = vmatmul.mubr.msk.f32.gmra.mrb[14].mxu1 %vm81_vm0, %v50_v6  ;;  %2254 = vmatprep.subr.bf16.mxu0 %v3106_v50 }
  0x37   :  { %2200 = vmatpush1.bf16.msra.mxu1 %v3154_v7  ;;  %498 = vmatprep.mubr.f32.mxu1 %v2968_v0 }
  0x38   :  { %2202 = vmatprep.subr.bf16.mxu1 %v3157_v8  ;;  %2049 = vmatmul.mubr.msk.f32.gmra.mrb[10].mxu0 %vm81_vm0, %v3119_v55  ;;  %v3220_v55 = vpack.c.bf16 %v419_v53, %v415_v52 }
  0x39   :  { %2256 = vmatpush1.bf16.msra.mxu0 %v3121_v56  ;;  %206 = vmatprep.mubr.f32.mxu0 %v2968_v0 }
  0x3a   :  { %499 = vmatmul.mubr.f32.vlgmr.msra.gmra.mrb[16].mxu1 %v2968_v0  ;;  %2258 = vmatprep.subr.bf16.mxu0 %v3124_v57 }
  0x3b   :  { %2204 = vmatpush1.bf16.msra.mxu1 %v3167_v14  ;;  %569 = vmatprep.mubr.f32.mxu1 %v2968_v0 }
  0x3c   :  { %2206 = vmatprep.subr.bf16.mxu1 %v3170_v17  ;;  %2050 = vmatmul.mubr.msk.f32.gmra.mrb[12].mxu0 %vm81_vm0, %v49_v62  ;;  %v3223_v62 = vpack.c.bf16 %v418_v59, %v414_v58 }
  0x3d   :  { %2260 = vmatpush1.bf16.msra.mxu0 %v3138_v63  ;;  %212 = vmatprep.mubr.f32.mxu0 %v2968_v0 }
  0x3e   :  { %2262 = vmatprep.subr.bf16.mxu0 %v3141_v1 }
  0x3f   :  { %2208 = vmatpush1.bf16.msra.mxu1 %v3179_v24 }
  0x40   :  { %2210 = vmatprep.subr.bf16.mxu1 %v3183_v25  ;;  %2051 = vmatmul.mubr.msk.f32.gmra.mrb[14].mxu0 %vm81_vm0, %v50_v6  ;;  %v61_v6 = vlaneseq }
  0x41   :  { %2264 = vmatpush1.bf16.msra.mxu0 %v3154_v7  ;;  %674 = vmatprep.mubr.f32.mxu0 %v2968_v0 }
  0x42   :  { %2298 = vmatprep.subr.bf16.mxu0 %v3030_v11  ;;  %v62_v12 = vshrl.u32 %v61_v6, 7 }
  0x43   :  { %2212 = vmatpush1.bf16.msra.mxu1 %v3191_v31 }
  0x44   :  { %2214 = vmatprep.subr.bf16.mxu1 %v3194_v33  ;;  %v63_v13 = vsub.s32 0, %v62_v12  ;;  %v67_v19 = vsub.s32 1, %v62_v12  ;;  %v71_v40 = vsub.s32 2, %v62_v12  ;;  %v75_v41 = vsub.s32 3, %v62_v12 }
  0x46   :  { %v3255_v20 = vrot.slane %v59_v18, %v63_v13  ;;  %v3257_v21 = vrot.slane %v59_v18, %v67_v19  ;;  %v3261_v48 = vrot.slane %v59_v18, %v71_v40  ;;  %v3263_v52 = vrot.slane %v59_v18, %v75_v41 }
  0x47   :  { %2216 = vmatpush1.bf16.msra.mxu1 %v3201_v38 }
  0x48   :  { %2218 = vmatprep.subr.bf16.mxu1 %v3204_v39 }
  0x4b   :  { %2220 = vmatpush1.bf16.msra.mxu1 %v3211_v46 }
  0x4c   :  { %2222 = vmatprep.subr.bf16.mxu1 %v3214_v47 }
  0x4f   :  { %2224 = vmatpush1.bf16.msra.mxu1 %v3217_v54 }
  0x50   :  { %2226 = vmatprep.subr.bf16.mxu1 %v3220_v55 }
  0x53   :  { %2228 = vmatpush1.bf16.msra.mxu1 %v3223_v62 }
  0x54   :  { %2230 = vmatprep.subr.bf16.mxu1 %v3226_v2 }
  0x57   :  { %2232 = vmatpush1.bf16.msra.mxu1 %v3229_v5 }
  0x58   :  { %2266 = vmatprep.subr.bf16.mxu1 %v3157_v8 }
  0x5a   :  { %570 = vmatmul.mubr.f32.vlgmr.msra.gmra.mrb[0].mxu1 %v2968_v0 }
  0x5b   :  { %2268 = vmatpush1.bf16.msra.mxu1 %v3167_v14  ;;  %745 = vmatprep.mubr.f32.mxu1 %v2968_v0 }
  0x5c   :  { %2270 = vmatprep.subr.bf16.mxu1 %v3170_v17 }
  0x5f   :  { %2272 = vmatpush1.bf16.msra.mxu1 %v3179_v24 }
  0x60   :  { %2274 = vmatprep.subr.bf16.mxu1 %v3183_v25 }
  0x63   :  { %2276 = vmatpush1.bf16.msra.mxu1 %v3191_v31 }
  0x64   :  { %2278 = vmatprep.subr.bf16.mxu1 %v3194_v33 }
  0x67   :  { %2280 = vmatpush1.bf16.msra.mxu1 %v3201_v38 }
  0x68   :  { %2282 = vmatprep.subr.bf16.mxu1 %v3204_v39 }
  0x6b   :  { %2284 = vmatpush1.bf16.msra.mxu1 %v3211_v46 }
  0x6c   :  { %2286 = vmatprep.subr.bf16.mxu1 %v3214_v47 }
  0x6f   :  { %2288 = vmatpush1.bf16.msra.mxu1 %v3217_v54 }
  0x70   :  { %2290 = vmatprep.subr.bf16.mxu1 %v3220_v55 }
  0x73   :  { %2292 = vmatpush1.bf16.msra.mxu1 %v3223_v62 }
  0x74   :  { %2294 = vmatprep.subr.bf16.mxu1 %v3226_v2 }
  0x77   :  { %2296 = vmatpush1.bf16.msra.mxu1 %v3229_v5 }
  0x78   :  { %2330 = vmatprep.subr.bf16.mxu1 %v3157_v8 }
  0xf7   :  { %v172_v9 = vpop.f32.mrb[0].mxu0 }
  0xf8   :  { %v174_v10 = vpop.f32.mrb[1].mxu0  ;;  %v173_v26 = vadd.f32 %v172_v9, %v3255_v20 }
  0xf9   :  { %v175_v27 = vadd.f32 %v174_v10, %v3257_v21 }
 0x10d   :  { %v500_v28 = vpop.f32.mrb[16].mxu1 }
 0x10e   :  { %v576_v30 = vadd.f32 %v500_v28, %v173_v26  ;;  %v502_v34 = vpop.f32.mrb[17].mxu1 }
 0x10f   :  { %v577_v35 = vadd.f32 %v502_v34, %v175_v27 }
 0x110   :  { %v2060_v37 = vmul.f32 -1.442695, %v576_v30 }
 0x111   :  { %v2061_v36 = vmul.f32 -1.442695, %v577_v35 }
 0x113   :  { %2781 = vpow2.f32 %v2061_v36 }
 0x114   :  { %2783 = vpow2.f32 %v2060_v37 }
 0x11d   :  { %v2782_v44 = vpop.eup %2781 }
 0x11e   :  { %v2784_v45 = vpop.eup %2783  ;;  %v590_v51 = vadd.f32 1.0, %v2782_v44 }
 0x11f   :  { %v589_v53 = vadd.f32 1.0, %v2784_v45 }
 0x120   :  { %2785 = vrcp.f32 %v590_v51 }
 0x121   :  { %2787 = vrcp.f32 %v589_v53 }
 0x12a   :  { %v2786_v4 = vpop.eup %2785 }
 0x12b   :  { %v2788_v6 = vpop.eup %2787  ;;  %v599_v12 = vmul.f32 0.0, %v2786_v4 }
 0x12d   :  { %v571_v58 = vpop.f32.mrb[0].mxu1 }
 0x12e   :  { %v2731_v59 = vadd.f32 %v571_v58, %v3261_v48  ;;  %v573_v60 = vpop.f32.mrb[1].mxu1 }
 0x12f   :  { %v2732_v61 = vadd.f32 %v573_v60, %v3263_v52 }
 0x130   :  { %v2062_v3 = vmul.f32 -1.442695, %v2731_v59 }
 0x131   :  { %2789 = vtanh.f32 %v2732_v61 }
 0x132   :  { %2791 = vpow2.f32 %v2062_v3 }
 0x13b   :  { %v2790_v9 = vpop.eup %2789 }
 0x13c   :  { %v2792_v10 = vpop.eup %2791  ;;  %v600_v13 = vmul.f32 %v2790_v9, %v2788_v6 }
 0x13d   :  { %v591_v18 = vadd.f32 1.0, %v2792_v10 }
 0x13e   :  { %v3267_v19 = vadd.f32 %v600_v13, %v599_v12 }
 0x13f   :  { %2793 = vrcp.f32 %v591_v18 }
 0x140   :  { %2795 = vtanh.f32 %v3267_v19 }
 0x149   :  { %v2794_v26 = vpop.eup %2793 }
 0x14a   :  { %v2796_v27 = vpop.eup %2795 }
 0x14b   :  { %v3270_v28 = vmul.f32 %v2796_v27, %v2794_v26 }
 0x14d   :  { %675 = vmatmul.mubr.f32.vlgmr.msra.gmra.mrb[2].mxu0 %v3270_v28  ;;  %746 = vmatmul.mubr.f32.vlgmr.msra.gmra.mrb[2].mxu1 %v3270_v28 }
 0x14e   :  { %2300 = vmatpush1.bf16.msra.mxu0 %v3035_v15  ;;  %2332 = vmatpush1.bf16.msra.mxu1 %v3167_v14 }
 0x14f   :  { %2302 = vmatprep.subr.bf16.mxu0 %v3038_v16  ;;  %2334 = vmatprep.subr.bf16.mxu1 %v3170_v17 }
 0x150   :  { %851 = vmatprep.mubr.f32.mxu0 %v2968_v0  ;;  %922 = vmatprep.mubr.f32.mxu1 %v2968_v0 }
 0x152   :  { %2304 = vmatpush1.bf16.msra.mxu0 %v3048_v22  ;;  %2336 = vmatpush1.bf16.msra.mxu1 %v3179_v24 }
 0x153   :  { %2306 = vmatprep.subr.bf16.mxu0 %v3051_v23  ;;  %2338 = vmatprep.subr.bf16.mxu1 %v3183_v25 }
 0x156   :  { %2308 = vmatpush1.bf16.msra.mxu0 %v3062_v29  ;;  %2340 = vmatpush1.bf16.msra.mxu1 %v3191_v31 }
 0x157   :  { %2310 = vmatprep.subr.bf16.mxu0 %v3065_v32  ;;  %2342 = vmatprep.subr.bf16.mxu1 %v3194_v33 }
 0x15a   :  { %2312 = vmatpush1.bf16.msra.mxu0 %v3088_v42  ;;  %2344 = vmatpush1.bf16.msra.mxu1 %v3201_v38 }
 0x15b   :  { %2314 = vmatprep.subr.bf16.mxu0 %v3091_v43  ;;  %2346 = vmatprep.subr.bf16.mxu1 %v3204_v39 }
 0x15e   :  { %2316 = vmatpush1.bf16.msra.mxu0 %v3103_v49  ;;  %2348 = vmatpush1.bf16.msra.mxu1 %v3211_v46 }
 0x15f   :  { %2318 = vmatprep.subr.bf16.mxu0 %v3106_v50  ;;  %2350 = vmatprep.subr.bf16.mxu1 %v3214_v47 }
 0x162   :  { %2320 = vmatpush1.bf16.msra.mxu0 %v3121_v56  ;;  %2352 = vmatpush1.bf16.msra.mxu1 %v3217_v54 }
 0x163   :  { %2322 = vmatprep.subr.bf16.mxu0 %v3124_v57  ;;  %2354 = vmatprep.subr.bf16.mxu1 %v3220_v55 }
 0x166   :  { %2324 = vmatpush1.bf16.msra.mxu0 %v3138_v63  ;;  %2356 = vmatpush1.bf16.msra.mxu1 %v3223_v62 }
 0x167   :  { %2326 = vmatprep.subr.bf16.mxu0 %v3141_v1  ;;  %2358 = vmatprep.subr.bf16.mxu1 %v3226_v2 }
 0x16a   :  { %2328 = vmatpush1.bf16.msra.mxu0 %v3154_v7  ;;  %2360 = vmatpush1.bf16.msra.mxu1 %v3229_v5 }
 0x16b   :  { %2362 = vmatprep.subr.bf16.mxu0 %v3030_v11  ;;  %2394 = vmatprep.subr.bf16.mxu1 %v3157_v8 }
 0x220   :  { %v676_v30 = vpop.f32.mrb[2].mxu0  ;;  %v747_v34 = vpop.f32.mrb[2].mxu1 }
 0x221   :  { %v2717_v35 = vadd.f32 %v676_v30, %v3255_v20  ;;  %v678_v36 = vpop.f32.mrb[3].mxu0  ;;  %v749_v37 = vpop.f32.mrb[3].mxu1  ;;  %v2733_v45 = vadd.f32 %v747_v34, %v3261_v48 }
 0x222   :  { %v2718_v40 = vadd.f32 %v678_v36, %v3257_v21  ;;  %v2734_v51 = vadd.f32 %v749_v37, %v3263_v52 }
 0x223   :  { %v2063_v41 = vmul.f32 -1.442695, %v2717_v35  ;;  %v2065_v53 = vmul.f32 -1.442695, %v2733_v45 }
 0x224   :  { %v2064_v44 = vmul.f32 -1.442695, %v2718_v40 }
 0x225   :  { %2797 = vpow2.f32 %v2063_v41 }
 0x226   :  { %2799 = vpow2.f32 %v2064_v44 }
 0x227   :  { %2801 = vtanh.f32 %v2734_v51 }
 0x228   :  { %2803 = vpow2.f32 %v2065_v53 }
 0x22f   :  { %v2798_v58 = vpop.eup %2797 }
 0x230   :  { %v765_v59 = vadd.f32 1.0, %v2798_v58  ;;  %v2800_v60 = vpop.eup %2799 }
 0x231   :  { %v766_v61 = vadd.f32 1.0, %v2800_v60  ;;  %v2802_v3 = vpop.eup %2801 }
 0x232   :  { %2805 = vrcp.f32 %v765_v59  ;;  %v2804_v4 = vpop.eup %2803 }
 0x233   :  { %2807 = vrcp.f32 %v766_v61  ;;  %v767_v12 = vadd.f32 1.0, %v2804_v4 }
 0x235   :  { %2809 = vrcp.f32 %v767_v12 }
 0x23c   :  { %v2806_v6 = vpop.eup %2805 }
 0x23d   :  { %v776_v9 = vmul.f32 %v2806_v6, %v2802_v3  ;;  %v2808_v10 = vpop.eup %2807 }
 0x23e   :  { %v775_v13 = vmul.f32 %v2808_v10, %v3267_v19 }
 0x23f   :  { %v2810_v26 = vpop.eup %2809 }
 0x240   :  { %v3313_v18 = vadd.f32 %v776_v9, %v775_v13 }
 0x242   :  { %2811 = vtanh.f32 %v3313_v18 }
 0x24c   :  { %v2812_v27 = vpop.eup %2811 }
 0x24d   :  { %v3316_v30 = vmul.f32 %v2812_v27, %v2810_v26 }
 0x24f   :  { %852 = vmatmul.mubr.f32.vlgmr.msra.gmra.mrb[4].mxu0 %v3316_v30  ;;  %923 = vmatmul.mubr.f32.vlgmr.msra.gmra.mrb[4].mxu1 %v3316_v30 }
 0x250   :  { %2364 = vmatpush1.bf16.msra.mxu0 %v3035_v15  ;;  %2396 = vmatpush1.bf16.msra.mxu1 %v3167_v14 }
 0x251   :  { %2366 = vmatprep.subr.bf16.mxu0 %v3038_v16  ;;  %2398 = vmatprep.subr.bf16.mxu1 %v3170_v17 }
 0x252   :  { %1028 = vmatprep.mubr.f32.mxu0 %v2968_v0  ;;  %1099 = vmatprep.mubr.f32.mxu1 %v2968_v0 }
 0x254   :  { %2368 = vmatpush1.bf16.msra.mxu0 %v3048_v22  ;;  %2400 = vmatpush1.bf16.msra.mxu1 %v3179_v24 }
 0x255   :  { %2370 = vmatprep.subr.bf16.mxu0 %v3051_v23  ;;  %2402 = vmatprep.subr.bf16.mxu1 %v3183_v25 }
 0x258   :  { %2372 = vmatpush1.bf16.msra.mxu0 %v3062_v29  ;;  %2404 = vmatpush1.bf16.msra.mxu1 %v3191_v31 }
 0x259   :  { %2374 = vmatprep.subr.bf16.mxu0 %v3065_v32  ;;  %2406 = vmatprep.subr.bf16.mxu1 %v3194_v33 }
 0x25c   :  { %2376 = vmatpush1.bf16.msra.mxu0 %v3088_v42  ;;  %2408 = vmatpush1.bf16.msra.mxu1 %v3201_v38 }
 0x25d   :  { %2378 = vmatprep.subr.bf16.mxu0 %v3091_v43  ;;  %2410 = vmatprep.subr.bf16.mxu1 %v3204_v39 }
 0x260   :  { %2380 = vmatpush1.bf16.msra.mxu0 %v3103_v49  ;;  %2412 = vmatpush1.bf16.msra.mxu1 %v3211_v46 }
 0x261   :  { %2382 = vmatprep.subr.bf16.mxu0 %v3106_v50  ;;  %2414 = vmatprep.subr.bf16.mxu1 %v3214_v47 }
 0x264   :  { %2384 = vmatpush1.bf16.msra.mxu0 %v3121_v56  ;;  %2416 = vmatpush1.bf16.msra.mxu1 %v3217_v54 }
 0x265   :  { %2386 = vmatprep.subr.bf16.mxu0 %v3124_v57  ;;  %2418 = vmatprep.subr.bf16.mxu1 %v3220_v55 }
 0x268   :  { %2388 = vmatpush1.bf16.msra.mxu0 %v3138_v63  ;;  %2420 = vmatpush1.bf16.msra.mxu1 %v3223_v62 }
 0x269   :  { %2390 = vmatprep.subr.bf16.mxu0 %v3141_v1  ;;  %2422 = vmatprep.subr.bf16.mxu1 %v3226_v2 }
 0x26c   :  { %2392 = vmatpush1.bf16.msra.mxu0 %v3154_v7  ;;  %2424 = vmatpush1.bf16.msra.mxu1 %v3229_v5 }
 0x26d   :  { %2426 = vmatprep.subr.bf16.mxu0 %v3030_v11  ;;  %2458 = vmatprep.subr.bf16.mxu1 %v3157_v8 }
 0x322   :  { %v853_v19 = vpop.f32.mrb[4].mxu0  ;;  %v924_v34 = vpop.f32.mrb[4].mxu1 }
 0x323   :  { %v2719_v35 = vadd.f32 %v853_v19, %v3255_v20  ;;  %v855_v36 = vpop.f32.mrb[5].mxu0  ;;  %v926_v37 = vpop.f32.mrb[5].mxu1  ;;  %v2735_v45 = vadd.f32 %v924_v34, %v3261_v48 }
 0x324   :  { %v2720_v40 = vadd.f32 %v855_v36, %v3257_v21  ;;  %v2736_v51 = vadd.f32 %v926_v37, %v3263_v52 }
 0x325   :  { %v2066_v41 = vmul.f32 -1.442695, %v2719_v35  ;;  %v2068_v53 = vmul.f32 -1.442695, %v2735_v45 }
 0x326   :  { %v2067_v44 = vmul.f32 -1.442695, %v2720_v40 }
 0x327   :  { %2813 = vpow2.f32 %v2066_v41 }
 0x328   :  { %2815 = vpow2.f32 %v2067_v44 }
 0x329   :  { %2817 = vtanh.f32 %v2736_v51 }
 0x32a   :  { %2819 = vpow2.f32 %v2068_v53 }
 0x331   :  { %v2814_v58 = vpop.eup %2813 }
 0x332   :  { %v942_v59 = vadd.f32 1.0, %v2814_v58  ;;  %v2816_v60 = vpop.eup %2815 }
 0x333   :  { %v943_v61 = vadd.f32 1.0, %v2816_v60  ;;  %v2818_v3 = vpop.eup %2817 }
 0x334   :  { %2821 = vrcp.f32 %v942_v59  ;;  %v2820_v4 = vpop.eup %2819 }
 0x335   :  { %2823 = vrcp.f32 %v943_v61  ;;  %v944_v12 = vadd.f32 1.0, %v2820_v4 }
 0x337   :  { %2825 = vrcp.f32 %v944_v12 }
 0x33e   :  { %v2822_v6 = vpop.eup %2821 }
 0x33f   :  { %v953_v9 = vmul.f32 %v2822_v6, %v2818_v3  ;;  %v2824_v10 = vpop.eup %2823 }
 0x340   :  { %v952_v13 = vmul.f32 %v2824_v10, %v3313_v18 }
 0x341   :  { %v2826_v27 = vpop.eup %2825 }
 0x342   :  { %v3359_v26 = vadd.f32 %v953_v9, %v952_v13 }
 0x344   :  { %2827 = vtanh.f32 %v3359_v26 }
 0x34e   :  { %v2828_v19 = vpop.eup %2827 }
 0x34f   :  { %v3362_v34 = vmul.f32 %v2828_v19, %v2826_v27 }
 0x351   :  { %1029 = vmatmul.mubr.f32.vlgmr.msra.gmra.mrb[6].mxu0 %v3362_v34  ;;  %1100 = vmatmul.mubr.f32.vlgmr.msra.gmra.mrb[6].mxu1 %v3362_v34 }
 0x352   :  { %2428 = vmatpush1.bf16.msra.mxu0 %v3035_v15  ;;  %2460 = vmatpush1.bf16.msra.mxu1 %v3167_v14 }
 0x353   :  { %2430 = vmatprep.subr.bf16.mxu0 %v3038_v16  ;;  %2462 = vmatprep.subr.bf16.mxu1 %v3170_v17 }
 0x354   :  { %1205 = vmatprep.mubr.f32.mxu0 %v2968_v0  ;;  %1276 = vmatprep.mubr.f32.mxu1 %v2968_v0 }
 0x356   :  { %2432 = vmatpush1.bf16.msra.mxu0 %v3048_v22  ;;  %2464 = vmatpush1.bf16.msra.mxu1 %v3179_v24 }
 0x357   :  { %2434 = vmatprep.subr.bf16.mxu0 %v3051_v23  ;;  %2466 = vmatprep.subr.bf16.mxu1 %v3183_v25 }
 0x35a   :  { %2436 = vmatpush1.bf16.msra.mxu0 %v3062_v29  ;;  %2468 = vmatpush1.bf16.msra.mxu1 %v3191_v31 }
 0x35b   :  { %2438 = vmatprep.subr.bf16.mxu0 %v3065_v32  ;;  %2470 = vmatprep.subr.bf16.mxu1 %v3194_v33 }
 0x35e   :  { %2440 = vmatpush1.bf16.msra.mxu0 %v3088_v42  ;;  %2472 = vmatpush1.bf16.msra.mxu1 %v3201_v38 }
 0x35f   :  { %2442 = vmatprep.subr.bf16.mxu0 %v3091_v43  ;;  %2474 = vmatprep.subr.bf16.mxu1 %v3204_v39 }
 0x362   :  { %2444 = vmatpush1.bf16.msra.mxu0 %v3103_v49  ;;  %2476 = vmatpush1.bf16.msra.mxu1 %v3211_v46 }
 0x363   :  { %2446 = vmatprep.subr.bf16.mxu0 %v3106_v50  ;;  %2478 = vmatprep.subr.bf16.mxu1 %v3214_v47 }
 0x366   :  { %2448 = vmatpush1.bf16.msra.mxu0 %v3121_v56  ;;  %2480 = vmatpush1.bf16.msra.mxu1 %v3217_v54 }
 0x367   :  { %2450 = vmatprep.subr.bf16.mxu0 %v3124_v57  ;;  %2482 = vmatprep.subr.bf16.mxu1 %v3220_v55 }
 0x36a   :  { %2452 = vmatpush1.bf16.msra.mxu0 %v3138_v63  ;;  %2484 = vmatpush1.bf16.msra.mxu1 %v3223_v62 }
 0x36b   :  { %2454 = vmatprep.subr.bf16.mxu0 %v3141_v1  ;;  %2486 = vmatprep.subr.bf16.mxu1 %v3226_v2 }
 0x36e   :  { %2456 = vmatpush1.bf16.msra.mxu0 %v3154_v7  ;;  %2488 = vmatpush1.bf16.msra.mxu1 %v3229_v5 }
 0x36f   :  { %2490 = vmatprep.subr.bf16.mxu0 %v3030_v11  ;;  %2522 = vmatprep.subr.bf16.mxu1 %v3157_v8 }
 0x424   :  { %v1030_v18 = vpop.f32.mrb[6].mxu0  ;;  %v1101_v35 = vpop.f32.mrb[6].mxu1 }
 0x425   :  { %v2721_v36 = vadd.f32 %v1030_v18, %v3255_v20  ;;  %v1032_v37 = vpop.f32.mrb[7].mxu0  ;;  %v1103_v40 = vpop.f32.mrb[7].mxu1  ;;  %v2737_v51 = vadd.f32 %v1101_v35, %v3261_v48 }
 0x426   :  { %v2722_v41 = vadd.f32 %v1032_v37, %v3257_v21  ;;  %v2738_v53 = vadd.f32 %v1103_v40, %v3263_v52 }
 0x427   :  { %v2069_v44 = vmul.f32 -1.442695, %v2721_v36  ;;  %v2071_v58 = vmul.f32 -1.442695, %v2737_v51 }
 0x428   :  { %v2070_v45 = vmul.f32 -1.442695, %v2722_v41 }
 0x429   :  { %2829 = vpow2.f32 %v2069_v44 }
 0x42a   :  { %2831 = vpow2.f32 %v2070_v45 }
 0x42b   :  { %2833 = vtanh.f32 %v2738_v53 }
 0x42c   :  { %2835 = vpow2.f32 %v2071_v58 }
 0x433   :  { %v2830_v59 = vpop.eup %2829 }
 0x434   :  { %v1119_v60 = vadd.f32 1.0, %v2830_v59  ;;  %v2832_v61 = vpop.eup %2831 }
 0x435   :  { %v1120_v3 = vadd.f32 1.0, %v2832_v61  ;;  %v2834_v4 = vpop.eup %2833 }
 0x436   :  { %2837 = vrcp.f32 %v1119_v60  ;;  %v2836_v6 = vpop.eup %2835 }
 0x437   :  { %2839 = vrcp.f32 %v1120_v3  ;;  %v1121_v13 = vadd.f32 1.0, %v2836_v6 }
 0x439   :  { %2841 = vrcp.f32 %v1121_v13 }
 0x440   :  { %v2838_v9 = vpop.eup %2837 }
 0x441   :  { %v1130_v10 = vmul.f32 %v2838_v9, %v2834_v4  ;;  %v2840_v12 = vpop.eup %2839 }
 0x442   :  { %v1129_v27 = vmul.f32 %v2840_v12, %v3359_v26 }
 0x443   :  { %v2842_v18 = vpop.eup %2841 }
 0x444   :  { %v3405_v19 = vadd.f32 %v1130_v10, %v1129_v27 }
 0x446   :  { %2843 = vtanh.f32 %v3405_v19 }
 0x450   :  { %v2844_v35 = vpop.eup %2843 }
 0x451   :  { %v3408_v36 = vmul.f32 %v2844_v35, %v2842_v18 }
 0x453   :  { %1206 = vmatmul.mubr.f32.vlgmr.msra.gmra.mrb[8].mxu0 %v3408_v36  ;;  %1277 = vmatmul.mubr.f32.vlgmr.msra.gmra.mrb[8].mxu1 %v3408_v36 }
 0x454   :  { %2492 = vmatpush1.bf16.msra.mxu0 %v3035_v15  ;;  %2524 = vmatpush1.bf16.msra.mxu1 %v3167_v14 }
 0x455   :  { %2494 = vmatprep.subr.bf16.mxu0 %v3038_v16  ;;  %2526 = vmatprep.subr.bf16.mxu1 %v3170_v17 }
 0x456   :  { %1382 = vmatprep.mubr.f32.mxu0 %v2968_v0  ;;  %1453 = vmatprep.mubr.f32.mxu1 %v2968_v0 }
 0x458   :  { %2496 = vmatpush1.bf16.msra.mxu0 %v3048_v22  ;;  %2528 = vmatpush1.bf16.msra.mxu1 %v3179_v24 }
 0x459   :  { %2498 = vmatprep.subr.bf16.mxu0 %v3051_v23  ;;  %2530 = vmatprep.subr.bf16.mxu1 %v3183_v25 }
 0x45c   :  { %2500 = vmatpush1.bf16.msra.mxu0 %v3062_v29  ;;  %2532 = vmatpush1.bf16.msra.mxu1 %v3191_v31 }
 0x45d   :  { %2502 = vmatprep.subr.bf16.mxu0 %v3065_v32  ;;  %2534 = vmatprep.subr.bf16.mxu1 %v3194_v33 }
 0x460   :  { %2504 = vmatpush1.bf16.msra.mxu0 %v3088_v42  ;;  %2536 = vmatpush1.bf16.msra.mxu1 %v3201_v38 }
 0x461   :  { %2506 = vmatprep.subr.bf16.mxu0 %v3091_v43  ;;  %2538 = vmatprep.subr.bf16.mxu1 %v3204_v39 }
 0x464   :  { %2508 = vmatpush1.bf16.msra.mxu0 %v3103_v49  ;;  %2540 = vmatpush1.bf16.msra.mxu1 %v3211_v46 }
 0x465   :  { %2510 = vmatprep.subr.bf16.mxu0 %v3106_v50  ;;  %2542 = vmatprep.subr.bf16.mxu1 %v3214_v47 }
 0x468   :  { %2512 = vmatpush1.bf16.msra.mxu0 %v3121_v56  ;;  %2544 = vmatpush1.bf16.msra.mxu1 %v3217_v54 }
 0x469   :  { %2514 = vmatprep.subr.bf16.mxu0 %v3124_v57  ;;  %2546 = vmatprep.subr.bf16.mxu1 %v3220_v55 }
 0x46c   :  { %2516 = vmatpush1.bf16.msra.mxu0 %v3138_v63  ;;  %2548 = vmatpush1.bf16.msra.mxu1 %v3223_v62 }
 0x46d   :  { %2518 = vmatprep.subr.bf16.mxu0 %v3141_v1  ;;  %2550 = vmatprep.subr.bf16.mxu1 %v3226_v2 }
 0x470   :  { %2520 = vmatpush1.bf16.msra.mxu0 %v3154_v7  ;;  %2552 = vmatpush1.bf16.msra.mxu1 %v3229_v5 }
 0x471   :  { %2554 = vmatprep.subr.bf16.mxu0 %v3030_v11  ;;  %2586 = vmatprep.subr.bf16.mxu1 %v3157_v8 }
 0x526   :  { %v1207_v26 = vpop.f32.mrb[8].mxu0  ;;  %v1278_v37 = vpop.f32.mrb[8].mxu1 }
 0x527   :  { %v2723_v40 = vadd.f32 %v1207_v26, %v3255_v20  ;;  %v1209_v41 = vpop.f32.mrb[9].mxu0  ;;  %v1280_v44 = vpop.f32.mrb[9].mxu1  ;;  %v2739_v58 = vadd.f32 %v1278_v37, %v3261_v48 }
 0x528   :  { %v2724_v45 = vadd.f32 %v1209_v41, %v3257_v21  ;;  %v2740_v59 = vadd.f32 %v1280_v44, %v3263_v52 }
 0x529   :  { %v2072_v51 = vmul.f32 -1.442695, %v2723_v40  ;;  %v2074_v60 = vmul.f32 -1.442695, %v2739_v58 }
 0x52a   :  { %v2073_v53 = vmul.f32 -1.442695, %v2724_v45 }
 0x52b   :  { %2845 = vpow2.f32 %v2072_v51 }
 0x52c   :  { %2847 = vpow2.f32 %v2073_v53 }
 0x52d   :  { %2849 = vtanh.f32 %v2740_v59 }
 0x52e   :  { %2851 = vpow2.f32 %v2074_v60 }
 0x535   :  { %v2846_v61 = vpop.eup %2845 }
 0x536   :  { %v1296_v3 = vadd.f32 1.0, %v2846_v61  ;;  %v2848_v4 = vpop.eup %2847 }
 0x537   :  { %v1297_v6 = vadd.f32 1.0, %v2848_v4  ;;  %v2850_v9 = vpop.eup %2849 }
 0x538   :  { %2853 = vrcp.f32 %v1296_v3  ;;  %v2852_v10 = vpop.eup %2851 }
 0x539   :  { %2855 = vrcp.f32 %v1297_v6  ;;  %v1298_v18 = vadd.f32 1.0, %v2852_v10 }
 0x53b   :  { %2857 = vrcp.f32 %v1298_v18 }
 0x542   :  { %v2854_v12 = vpop.eup %2853 }
 0x543   :  { %v1307_v13 = vmul.f32 %v2854_v12, %v2850_v9  ;;  %v2856_v27 = vpop.eup %2855 }
 0x544   :  { %v1306_v35 = vmul.f32 %v2856_v27, %v3405_v19 }
 0x545   :  { %v2858_v37 = vpop.eup %2857 }
 0x546   :  { %v3451_v26 = vadd.f32 %v1307_v13, %v1306_v35 }
 0x548   :  { %2859 = vtanh.f32 %v3451_v26 }
 0x552   :  { %v2860_v40 = vpop.eup %2859 }
 0x553   :  { %v3454_v41 = vmul.f32 %v2860_v40, %v2858_v37 }
 0x555   :  { %1383 = vmatmul.mubr.f32.vlgmr.msra.gmra.mrb[10].mxu0 %v3454_v41  ;;  %1454 = vmatmul.mubr.f32.vlgmr.msra.gmra.mrb[10].mxu1 %v3454_v41 }
 0x556   :  { %2556 = vmatpush1.bf16.msra.mxu0 %v3035_v15  ;;  %2588 = vmatpush1.bf16.msra.mxu1 %v3167_v14 }
 0x557   :  { %2558 = vmatprep.subr.bf16.mxu0 %v3038_v16  ;;  %2590 = vmatprep.subr.bf16.mxu1 %v3170_v17 }
 0x558   :  { %1559 = vmatprep.mubr.f32.mxu0 %v2968_v0  ;;  %1630 = vmatprep.mubr.f32.mxu1 %v2968_v0 }
 0x55a   :  { %2560 = vmatpush1.bf16.msra.mxu0 %v3048_v22  ;;  %2592 = vmatpush1.bf16.msra.mxu1 %v3179_v24 }
 0x55b   :  { %2562 = vmatprep.subr.bf16.mxu0 %v3051_v23  ;;  %2594 = vmatprep.subr.bf16.mxu1 %v3183_v25 }
 0x55e   :  { %2564 = vmatpush1.bf16.msra.mxu0 %v3062_v29  ;;  %2596 = vmatpush1.bf16.msra.mxu1 %v3191_v31 }
 0x55f   :  { %2566 = vmatprep.subr.bf16.mxu0 %v3065_v32  ;;  %2598 = vmatprep.subr.bf16.mxu1 %v3194_v33 }
 0x562   :  { %2568 = vmatpush1.bf16.msra.mxu0 %v3088_v42  ;;  %2600 = vmatpush1.bf16.msra.mxu1 %v3201_v38 }
 0x563   :  { %2570 = vmatprep.subr.bf16.mxu0 %v3091_v43  ;;  %2602 = vmatprep.subr.bf16.mxu1 %v3204_v39 }
 0x566   :  { %2572 = vmatpush1.bf16.msra.mxu0 %v3103_v49  ;;  %2604 = vmatpush1.bf16.msra.mxu1 %v3211_v46 }
 0x567   :  { %2574 = vmatprep.subr.bf16.mxu0 %v3106_v50  ;;  %2606 = vmatprep.subr.bf16.mxu1 %v3214_v47 }
 0x56a   :  { %2576 = vmatpush1.bf16.msra.mxu0 %v3121_v56  ;;  %2608 = vmatpush1.bf16.msra.mxu1 %v3217_v54 }
 0x56b   :  { %2578 = vmatprep.subr.bf16.mxu0 %v3124_v57  ;;  %2610 = vmatprep.subr.bf16.mxu1 %v3220_v55 }
 0x56e   :  { %2580 = vmatpush1.bf16.msra.mxu0 %v3138_v63  ;;  %2612 = vmatpush1.bf16.msra.mxu1 %v3223_v62 }
 0x56f   :  { %2582 = vmatprep.subr.bf16.mxu0 %v3141_v1  ;;  %2614 = vmatprep.subr.bf16.mxu1 %v3226_v2 }
 0x572   :  { %2584 = vmatpush1.bf16.msra.mxu0 %v3154_v7  ;;  %2616 = vmatpush1.bf16.msra.mxu1 %v3229_v5 }
 0x573   :  { %2618 = vmatprep.subr.bf16.mxu0 %v3030_v11  ;;  %2650 = vmatprep.subr.bf16.mxu1 %v3157_v8 }
 0x628   :  { %v1384_v19 = vpop.f32.mrb[10].mxu0  ;;  %v1455_v44 = vpop.f32.mrb[10].mxu1 }
 0x629   :  { %v2725_v45 = vadd.f32 %v1384_v19, %v3255_v20  ;;  %v1386_v51 = vpop.f32.mrb[11].mxu0  ;;  %v1457_v53 = vpop.f32.mrb[11].mxu1  ;;  %v2741_v61 = vadd.f32 %v1455_v44, %v3261_v48 }
 0x62a   :  { %v2726_v58 = vadd.f32 %v1386_v51, %v3257_v21  ;;  %v2742_v3 = vadd.f32 %v1457_v53, %v3263_v52  ;;  %v1858_v51 = vld [vmem:[%s3652_s4 + $0x20] sm:$0xff]  ;;  %v1859_v53 = vld [vmem:[%s3652_s4 + $0x28] sm:$0xff] }
 0x62b   :  { %v2075_v59 = vmul.f32 -1.442695, %v2725_v45  ;;  %v2077_v4 = vmul.f32 -1.442695, %v2741_v61 }
 0x62c   :  { %v2076_v60 = vmul.f32 -1.442695, %v2726_v58  ;;  %v2689_v58 = vpack.c.bf16 %v1859_v53, %v1858_v51 }
 0x62d   :  { %2861 = vpow2.f32 %v2075_v59  ;;  %v1860_v59 = vld [vmem:[%s3652_s4 + $0x30] sm:$0xff] }
 0x62e   :  { %2863 = vpow2.f32 %v2076_v60  ;;  %v1861_v60 = vld [vmem:[%s3652_s4 + $0x38] sm:$0xff] }
 0x62f   :  { %2865 = vtanh.f32 %v2742_v3  ;;  %v2693_v61 = vpack.c.bf16 %v1861_v60, %v1860_v59  ;;  %v1862_v3 = vld [vmem:[%s3652_s4 + $0x40] sm:$0xff] }
 0x630   :  { %2867 = vpow2.f32 %v2077_v4 }
 0x637   :  { %v2862_v11 = vpop.eup %2861 }
 0x638   :  { %v1473_v6 = vadd.f32 1.0, %v2862_v11  ;;  %v2864_v8 = vpop.eup %2863  ;;  %v1864_v11 = vld [vmem:[%s3652_s4 + $0x50] sm:$0xff] }
 0x639   :  { %v1474_v9 = vadd.f32 1.0, %v2864_v8  ;;  %v2866_v10 = vpop.eup %2865 }
 0x63a   :  { %2869 = vrcp.f32 %v1473_v6  ;;  %v2868_v12 = vpop.eup %2867  ;;  %v1865_v6 = vld [vmem:[%s3652_s4 + $0x58] sm:$0xff] }
 0x63b   :  { %2871 = vrcp.f32 %v1474_v9  ;;  %v1475_v35 = vadd.f32 1.0, %v2868_v12  ;;  %v2701_v8 = vpack.c.bf16 %v1865_v6, %v1864_v11  ;;  %v1866_v9 = vld [vmem:[%s3652_s4 + $0x60] sm:$0xff] }
 0x63d   :  { %2873 = vrcp.f32 %v1475_v35 }
 0x644   :  { %v2870_v13 = vpop.eup %2869 }
 0x645   :  { %v1484_v27 = vmul.f32 %v2870_v13, %v2866_v10  ;;  %v2872_v18 = vpop.eup %2871  ;;  %v1867_v10 = vld [vmem:[%s3652_s4 + $0x68] sm:$0xff]  ;;  %v1868_v13 = vld [vmem:[%s3652_s4 + $0x70] sm:$0xff] }
 0x646   :  { %v1483_v37 = vmul.f32 %v2872_v18, %v3451_v26  ;;  %v2705_v12 = vpack.c.bf16 %v1867_v10, %v1866_v9 }
 0x647   :  { %v2874_v19 = vpop.eup %2873 }
 0x648   :  { %v3497_v40 = vadd.f32 %v1484_v27, %v1483_v37  ;;  %v1869_v27 = vld [vmem:[%s3652_s4 + $0x78] sm:$0xff] }
 0x649   :  { %v2709_v18 = vpack.c.bf16 %v1869_v27, %v1868_v13 }
 0x64a   :  { %2875 = vtanh.f32 %v3497_v40 }
 0x654   :  { %v2876_v44 = vpop.eup %2875 }
 0x655   :  { %v3500_v45 = vmul.f32 %v2876_v44, %v2874_v19 }
 0x657   :  { %1560 = vmatmul.mubr.f32.vlgmr.msra.gmra.mrb[12].mxu0 %v3500_v45  ;;  %1631 = vmatmul.mubr.f32.vlgmr.msra.gmra.mrb[12].mxu1 %v3500_v45 }
 0x658   :  { %2620 = vmatpush1.bf16.msra.mxu0 %v3035_v15  ;;  %2652 = vmatpush1.bf16.msra.mxu1 %v3167_v14  ;;  %v1855_v15 = vld [vmem:[%s3652_s4 + $0x8] sm:$0xff] }
 0x659   :  { %2622 = vmatprep.subr.bf16.mxu0 %v3038_v16  ;;  %2654 = vmatprep.subr.bf16.mxu1 %v3170_v17 }
 0x65a   :  { %1736 = vmatprep.mubr.f32.mxu0 %v2968_v0  ;;  %1807 = vmatprep.mubr.f32.mxu1 %v2968_v0  ;;  %v1854_v0 = vld [vmem:[%s3652_s4] sm:$0xff] }
 0x65b   :  { %v2681_v16 = vpack.c.bf16 %v1855_v15, %v1854_v0 }
 0x65c   :  { %2624 = vmatpush1.bf16.msra.mxu0 %v3048_v22  ;;  %2656 = vmatpush1.bf16.msra.mxu1 %v3179_v24 }
 0x65d   :  { %2626 = vmatprep.subr.bf16.mxu0 %v3051_v23  ;;  %2658 = vmatprep.subr.bf16.mxu1 %v3183_v25 }
 0x660   :  { %2628 = vmatpush1.bf16.msra.mxu0 %v3062_v29  ;;  %2660 = vmatpush1.bf16.msra.mxu1 %v3191_v31 }
 0x661   :  { %2630 = vmatprep.subr.bf16.mxu0 %v3065_v32  ;;  %2662 = vmatprep.subr.bf16.mxu1 %v3194_v33 }
 0x664   :  { %2632 = vmatpush1.bf16.msra.mxu0 %v3088_v42  ;;  %2664 = vmatpush1.bf16.msra.mxu1 %v3201_v38 }
 0x665   :  { %2634 = vmatprep.subr.bf16.mxu0 %v3091_v43  ;;  %2666 = vmatprep.subr.bf16.mxu1 %v3204_v39 }
 0x668   :  { %2636 = vmatpush1.bf16.msra.mxu0 %v3103_v49  ;;  %2668 = vmatpush1.bf16.msra.mxu1 %v3211_v46 }
 0x669   :  { %2638 = vmatprep.subr.bf16.mxu0 %v3106_v50  ;;  %2670 = vmatprep.subr.bf16.mxu1 %v3214_v47 }
 0x66c   :  { %2640 = vmatpush1.bf16.msra.mxu0 %v3121_v56  ;;  %2672 = vmatpush1.bf16.msra.mxu1 %v3217_v54  ;;  %v1856_v54 = vld [vmem:[%s3652_s4 + $0x10] sm:$0xff] }
 0x66d   :  { %2642 = vmatprep.subr.bf16.mxu0 %v3124_v57  ;;  %2674 = vmatprep.subr.bf16.mxu1 %v3220_v55  ;;  %v1857_v55 = vld [vmem:[%s3652_s4 + $0x18] sm:$0xff] }
 0x66e   :  { %v2685_v26 = vpack.c.bf16 %v1857_v55, %v1856_v54 }
 0x670   :  { %2644 = vmatpush1.bf16.msra.mxu0 %v3138_v63  ;;  %2676 = vmatpush1.bf16.msra.mxu1 %v3223_v62 }
 0x671   :  { %2646 = vmatprep.subr.bf16.mxu0 %v3141_v1  ;;  %2678 = vmatprep.subr.bf16.mxu1 %v3226_v2 }
 0x674   :  { %2648 = vmatpush1.bf16.msra.mxu0 %v3154_v7  ;;  %2680 = vmatpush1.bf16.msra.mxu1 %v3229_v5 }
 0x675   :  { %2682 = vmatprep.subr.bf16.mxu0 %v2681_v16 }
 0x72a   :  { %v1561_v22 = vpop.f32.mrb[12].mxu0  ;;  %v1632_v23 = vpop.f32.mrb[12].mxu1 }
 0x72b   :  { %v2727_v29 = vadd.f32 %v1561_v22, %v3255_v20  ;;  %v1563_v32 = vpop.f32.mrb[13].mxu0  ;;  %v1634_v42 = vpop.f32.mrb[13].mxu1  ;;  %v2743_v56 = vadd.f32 %v1632_v23, %v3261_v48 }
 0x72c   :  { %v2728_v43 = vadd.f32 %v1563_v32, %v3257_v21  ;;  %v2744_v57 = vadd.f32 %v1634_v42, %v3263_v52 }
 0x72d   :  { %v2078_v49 = vmul.f32 -1.442695, %v2727_v29  ;;  %v2080_v63 = vmul.f32 -1.442695, %v2743_v56 }
 0x72e   :  { %v2079_v50 = vmul.f32 -1.442695, %v2728_v43 }
 0x72f   :  { %2877 = vpow2.f32 %v2078_v49 }
 0x730   :  { %2879 = vpow2.f32 %v2079_v50 }
 0x731   :  { %2881 = vtanh.f32 %v2744_v57 }
 0x732   :  { %2883 = vpow2.f32 %v2080_v63 }
 0x739   :  { %v2878_v1 = vpop.eup %2877 }
 0x73a   :  { %v1650_v7 = vadd.f32 1.0, %v2878_v1  ;;  %v2880_v14 = vpop.eup %2879 }
 0x73b   :  { %v1651_v17 = vadd.f32 1.0, %v2880_v14  ;;  %v2882_v24 = vpop.eup %2881 }
 0x73c   :  { %2885 = vrcp.f32 %v1650_v7  ;;  %v2884_v25 = vpop.eup %2883 }
 0x73d   :  { %2887 = vrcp.f32 %v1651_v17  ;;  %v1652_v39 = vadd.f32 1.0, %v2884_v25 }
 0x73f   :  { %2889 = vrcp.f32 %v1652_v39 }
 0x746   :  { %v2886_v31 = vpop.eup %2885 }
 0x747   :  { %v1661_v33 = vmul.f32 %v2886_v31, %v2882_v24  ;;  %v2888_v38 = vpop.eup %2887 }
 0x748   :  { %v1660_v46 = vmul.f32 %v2888_v38, %v3497_v40 }
 0x749   :  { %v2890_v62 = vpop.eup %2889 }
 0x74a   :  { %v3547_v47 = vadd.f32 %v1661_v33, %v1660_v46 }
 0x74c   :  { %2891 = vtanh.f32 %v3547_v47 }
 0x756   :  { %v2892_v2 = vpop.eup %2891 }
 0x757   :  { %v1664_v5 = vmul.f32 %v2892_v2, %v2890_v62 }
 0x759   :  { %1737 = vmatmul.mubr.f32.vlgmr.msra.gmra.mrb[14].mxu0 %v1664_v5  ;;  %1808 = vmatmul.mubr.f32.vlgmr.msra.gmra.mrb[14].mxu1 %v1664_v5 }
 0x75a   :  { %2684 = vmatpush3.bf16.msra.mxu0 %v2681_v16  ;;  %2149 = vmatprep.mubr.f32.mxu0 %v3270_v28  ;;  %v1863_v28 = vld [vmem:[%s3652_s4 + $0x48] sm:$0xff] }
 0x75b   :  { %2686 = vmatprep.subr.bf16.mxu0 %v2685_v26  ;;  %v2697_v4 = vpack.c.bf16 %v1863_v28, %v1862_v3 }
 0x75e   :  { %2688 = vmatpush3.bf16.msra.mxu0 %v2685_v26 }
 0x75f   :  { %2690 = vmatprep.subr.bf16.mxu0 %v2689_v58 }
 0x762   :  { %2692 = vmatpush3.bf16.msra.mxu0 %v2689_v58 }
 0x763   :  { %2694 = vmatprep.subr.bf16.mxu0 %v2693_v61 }
 0x766   :  { %2696 = vmatpush3.bf16.msra.mxu0 %v2693_v61 }
 0x767   :  { %2698 = vmatprep.subr.bf16.mxu0 %v2697_v4 }
 0x76a   :  { %2700 = vmatpush3.bf16.msra.mxu0 %v2697_v4 }
 0x76b   :  { %2702 = vmatprep.subr.bf16.mxu0 %v2701_v8 }
 0x76e   :  { %2704 = vmatpush3.bf16.msra.mxu0 %v2701_v8 }
 0x76f   :  { %2706 = vmatprep.subr.bf16.mxu0 %v2705_v12 }
 0x772   :  { %2708 = vmatpush3.bf16.msra.mxu0 %v2705_v12 }
 0x773   :  { %2710 = vmatprep.subr.bf16.mxu0 %v2709_v18 }
 0x776   :  { %2712 = vmatpush3.bf16.msra.mxu0 %v2709_v18 }
 0x779   :  { %2150 = vmatmul.mubr.f32.vlgmr.msra.gmra.mrb[16].mxu0 %v3316_v30 }
 0x77a   :  { %2152 = vmatprep.mubr.f32.mxu0 %v3362_v34 }
 0x77d   :  { %2153 = vmatmul.mubr.f32.gmra.mrb[18].mxu0 %v3408_v36 }
 0x77e   :  { %2155 = vmatprep.mubr.f32.mxu0 %v3454_v41 }
 0x781   :  { %2156 = vmatmul.mubr.f32.gmra.mrb[20].mxu0 %v3500_v45 }
 0x782   :  { %2158 = vmatprep.mubr.f32.mxu0 %v1664_v5 }
 0x82c   :  { %v1738_v35 = vpop.f32.mrb[14].mxu0  ;;  %v1809_v37 = vpop.f32.mrb[14].mxu1 }
 0x82d   :  { %v2729_v40 = vadd.f32 %v1738_v35, %v3255_v20  ;;  %v1740_v19 = vpop.f32.mrb[15].mxu0  ;;  %v1811_v44 = vpop.f32.mrb[15].mxu1  ;;  %v2745_v30 = vadd.f32 %v1809_v37, %v3261_v48  ;;  %v3605_v48 = vld [vmem:[%s3653_s5] ss:$0 sm:$0xff] }
 0x82e   :  { %v2730_v0 = vadd.f32 %v1740_v19, %v3257_v21  ;;  %v2746_v34 = vadd.f32 %v1811_v44, %v3263_v52 }
 0x82f   :  { %v2081_v15 = vmul.f32 -1.442695, %v2729_v40  ;;  %v2083_v36 = vmul.f32 -1.442695, %v2745_v30 }
 0x830   :  { %v2082_v16 = vmul.f32 -1.442695, %v2730_v0 }
 0x831   :  { %2893 = vpow2.f32 %v2081_v15 }
 0x832   :  { %2895 = vpow2.f32 %v2082_v16 }
 0x833   :  { %2897 = vtanh.f32 %v2746_v34 }
 0x834   :  { %2899 = vpow2.f32 %v2083_v36 }
 0x83b   :  { %v2894_v41 = vpop.eup %2893 }
 0x83c   :  { %v1827_v45 = vadd.f32 1.0, %v2894_v41  ;;  %v2896_v22 = vpop.eup %2895 }
 0x83d   :  { %v1828_v20 = vadd.f32 1.0, %v2896_v22  ;;  %v2898_v23 = vpop.eup %2897 }
 0x83e   :  { %2901 = vrcp.f32 %v1827_v45  ;;  %v2900_v29 = vpop.eup %2899 }
 0x83f   :  { %2903 = vrcp.f32 %v1828_v20  ;;  %v1829_v43 = vadd.f32 1.0, %v2900_v29 }
 0x841   :  { %2905 = vrcp.f32 %v1829_v43 }
 0x848   :  { %v2902_v21 = vpop.eup %2901 }
 0x849   :  { %v1838_v32 = vmul.f32 %v2902_v21, %v2898_v23  ;;  %v2904_v42 = vpop.eup %2903 }
 0x84a   :  { %v1837_v52 = vmul.f32 %v2904_v42, %v3547_v47 }
 0x84b   :  { %v2906_v55 = vpop.eup %2905 }
 0x84c   :  { %v2151_v49 = vpop.f32.mrb[16].mxu0  ;;  %v1839_v50 = vadd.f32 %v1838_v32, %v1837_v52 }
 0x84d   :  { %v1949_v56 = vadd.f32 %v2151_v49, %v3605_v48  ;;  %v1943_v57 = vpop.f32.mrb[17].mxu0 }
 0x84e   :  { %v1944_v63 = vadd.f32 %v3605_v48, %v1943_v57  ;;  %2907 = vtanh.f32 %v1839_v50 }
 0x84f   :  { %v2086_v1 = vmul.f32 -1.442695, %v1949_v56 }
 0x850   :  { %v2085_v7 = vmul.f32 -1.442695, %v1944_v63  ;;  %v2154_v14 = vpop.f32.mrb[18].mxu0 }
 0x851   :  { %2909 = vpow2.f32 %v2086_v1  ;;  %v1959_v17 = vadd.f32 %v2154_v14, %v3605_v48  ;;  %v1953_v24 = vpop.f32.mrb[19].mxu0 }
 0x852   :  { %2911 = vpow2.f32 %v2085_v7  ;;  %v1954_v25 = vadd.f32 %v3605_v48, %v1953_v24 }
 0x853   :  { %v2088_v31 = vmul.f32 -1.442695, %v1959_v17 }
 0x854   :  { %v2087_v33 = vmul.f32 -1.442695, %v1954_v25  ;;  %v2157_v38 = vpop.f32.mrb[20].mxu0 }
 0x855   :  { %2913 = vpow2.f32 %v2088_v31  ;;  %v1969_v39 = vadd.f32 %v2157_v38, %v3605_v48  ;;  %v1963_v46 = vpop.f32.mrb[21].mxu0 }
 0x856   :  { %2915 = vpow2.f32 %v2087_v33  ;;  %v1964_v47 = vadd.f32 %v3605_v48, %v1963_v46 }
 0x857   :  { %v2090_v54 = vmul.f32 -1.442695, %v1969_v39 }
 0x858   :  { %v2089_v62 = vmul.f32 -1.442695, %v1964_v47  ;;  %v2908_v2 = vpop.eup %2907 }
 0x859   :  { %2917 = vpow2.f32 %v2090_v54  ;;  %v1841_v5 = vmul.f32 %v2908_v2, %v2906_v55 }
 0x85a   :  { %2919 = vpow2.f32 %v2089_v62 }
 0x85b   :  { %v2910_v26 = vpop.eup %2909  ;;  %2159 = vmatmul.mubr.f32.gmra.mrb[22].mxu0 %v1841_v5 }
 0x85c   :  { %v2912_v51 = vpop.eup %2911  ;;  %v2007_v53 = vadd.f32 1.0, %v2910_v26 }
 0x85d   :  { %v2006_v58 = vadd.f32 1.0, %v2912_v51 }
 0x85e   :  { %2921 = vrcp.f32 %v2007_v53 }
 0x85f   :  { %v2914_v59 = vpop.eup %2913  ;;  %2923 = vrcp.f32 %v2006_v58 }
 0x860   :  { %v2916_v60 = vpop.eup %2915  ;;  %v2009_v61 = vadd.f32 1.0, %v2914_v59 }
 0x861   :  { %v2008_v3 = vadd.f32 1.0, %v2916_v60 }
 0x862   :  { %2925 = vrcp.f32 %v2009_v61 }
 0x863   :  { %v2918_v28 = vpop.eup %2917  ;;  %2927 = vrcp.f32 %v2008_v3 }
 0x864   :  { %v2920_v4 = vpop.eup %2919  ;;  %v2011_v11 = vadd.f32 1.0, %v2918_v28 }
 0x865   :  { %v2010_v6 = vadd.f32 1.0, %v2920_v4 }
 0x866   :  { %2929 = vrcp.f32 %v2011_v11 }
 0x867   :  { %2931 = vrcp.f32 %v2010_v6 }
 0x868   :  { %v2922_v8 = vpop.eup %2921 }
 0x869   :  { %v2924_v9 = vpop.eup %2923  ;;  %2032 = vst.msk [vmem:[%s3654_s6 + $0x8] sm:$0xff] %vm2030_vm1, %v2922_v8 }
 0x86a   :  { %2031 = vst.msk [vmem:[%s3654_s6] sm:$0xff] %vm2030_vm1, %v2924_v9 }
 0x86c   :  { %v2926_v10 = vpop.eup %2925 }
 0x86d   :  { %v2928_v12 = vpop.eup %2927  ;;  %2034 = vst.msk [vmem:[%s3654_s6 + $0x18] sm:$0xff] %vm2030_vm1, %v2926_v10 }
 0x86e   :  { %2033 = vst.msk [vmem:[%s3654_s6 + $0x10] sm:$0xff] %vm2030_vm1, %v2928_v12 }
 0x870   :  { %v2930_v13 = vpop.eup %2929 }
 0x871   :  { %v2932_v27 = vpop.eup %2931  ;;  %2036 = vst.msk [vmem:[%s3654_s6 + $0x28] sm:$0xff] %vm2030_vm1, %v2930_v13 }
 0x872   :  { %2035 = vst.msk [vmem:[%s3654_s6 + $0x20] sm:$0xff] %vm2030_vm1, %v2932_v27 }
 0x92e   :  { %v2160_v18 = vpop.f32.mrb[22].mxu0 }
 0x92f   :  { %v1979_v35 = vadd.f32 %v2160_v18, %v3605_v48  ;;  %v1973_v37 = vpop.f32.mrb[23].mxu0 }
 0x930   :  { %v1974_v40 = vadd.f32 %v3605_v48, %v1973_v37 }
 0x931   :  { %v2092_v19 = vmul.f32 -1.442695, %v1979_v35 }
 0x932   :  { %v2091_v44 = vmul.f32 -1.442695, %v1974_v40 }
 0x933   :  { %2933 = vpow2.f32 %v2092_v19 }
 0x934   :  { %2935 = vpow2.f32 %v2091_v44 }
 0x93d   :  { %v2934_v0 = vpop.eup %2933 }
 0x93e   :  { %v2936_v15 = vpop.eup %2935  ;;  %v2013_v16 = vadd.f32 1.0, %v2934_v0 }
 0x93f   :  { %v2012_v30 = vadd.f32 1.0, %v2936_v15 }
 0x940   :  { %2937 = vrcp.f32 %v2013_v16 }
 0x941   :  { %2939 = vrcp.f32 %v2012_v30 }
 0x94a   :  { %v2938_v34 = vpop.eup %2937 }
 0x94b   :  { %v2940_v36 = vpop.eup %2939  ;;  %2038 = vst.msk [vmem:[%s3654_s6 + $0x38] sm:$0xff] %vm2030_vm1, %v2938_v34 }
 0x94c   :  { %2037 = vst.msk [vmem:[%s3654_s6 + $0x30] sm:$0xff] %vm2030_vm1, %v2940_v36 }
 0x94d   :  { %2043 = vsyncpa [#allocation7], 1 }

</bundles_post_ra>
